<compile_context>
chip_gen: v7x
topology: tpu7x:2x2x1
jax: 0.10.0
libtpu: 0.0.40
codegen_flags: <defaults>
</compile_context>

<pallas_src>
import functools
import math

import jax
import jax.numpy as jnp
import numpy as np
from jax.experimental import pallas as pl
from jax.experimental.pallas import tpu as pltpu


_VMEM_LIMIT = 32 * 1024 * 1024  # explicit scoped-VMEM budget, safe on v5e/v6e/v7x


# --------------------------------------------------------------------------- #
# Tiled matmul kernels (qkv projection / output projection)
# --------------------------------------------------------------------------- #

def _matmul_kernel(x_ref, w_ref, o_ref, acc_ref):
    """grid = (M/tm, N/tn, K/tk); the K (reduction) axis is innermost/arbitrary."""
    @pl.when(pl.program_id(2) == 0)
    def _():
        acc_ref[...] = jnp.zeros_like(acc_ref)

    acc_ref[...] += jnp.dot(
        x_ref[...].astype(jnp.bfloat16),          # MXU runs bf16 at full rate
        w_ref[...].astype(jnp.bfloat16),
        preferred_element_type=jnp.float32,       # f32 accumulation
    )

    @pl.when(pl.program_id(2) == pl.num_programs(2) - 1)
    def _():
        o_ref[...] = acc_ref[...].astype(o_ref.dtype)


def _matmul_bias_kernel(x_ref, w_ref, b_ref, o_ref, acc_ref):
    @pl.when(pl.program_id(2) == 0)
    def _():
        acc_ref[...] = jnp.zeros_like(acc_ref)

    acc_ref[...] += jnp.dot(
        x_ref[...].astype(jnp.bfloat16),
        w_ref[...].astype(jnp.bfloat16),
        preferred_element_type=jnp.float32,
    )

    @pl.when(pl.program_id(2) == pl.num_programs(2) - 1)
    def _():
        o_ref[...] = (acc_ref[...] + b_ref[...].astype(jnp.float32)).astype(o_ref.dtype)


def _pick_tile(dim, target, align):
    """Largest `align`-multiple divisor of `dim` that is <= target, else full dim."""
    if dim <= target:
        return dim
    t = (target // align) * align
    while t >= align:
        if dim % t == 0:
            return t
        t -= align
    return dim


def pallas_linear(x, w, b=None, *, tm_target=512, tn_target=512, tk_target=512):
    """x: (M, K); w: (N_out, K) torch nn.Linear weight; optional b: (N_out,).

    Returns x @ w.T (+ b) via a tiled, double-buffered pipeline with an f32
    VMEM accumulator.  Tile targets are sized against the 32 MiB scoped-VMEM
    budget (v7x re-derivation: 64 MiB physical, same targets still fit)."""
    M, K = x.shape
    n_out = w.shape[0]
    wt = w.T  # (K, N_out); weight transpose is tiny next to the activations

    tm = _pick_tile(M, tm_target, 8)
    tn = _pick_tile(n_out, tn_target, 128)
    tk = _pick_tile(K, tk_target, 128)
    grid = (M // tm, n_out // tn, K // tk)

    cost = pl.CostEstimate(
        flops=2 * M * K * n_out,
        transcendentals=0,
        bytes_accessed=4 * (M * K + K * n_out + M * n_out),
    )
    cparams = pltpu.CompilerParams(
        dimension_semantics=("parallel", "parallel", "arbitrary"),
        vmem_limit_bytes=_VMEM_LIMIT,
    )

    x_spec = pl.BlockSpec((tm, tk), lambda i, j, k: (i, k))
    w_spec = pl.BlockSpec((tk, tn), lambda i, j, k: (k, j))
    o_spec = pl.BlockSpec((tm, tn), lambda i, j, k: (i, j))
    scratch = [pltpu.VMEM((tm, tn), jnp.float32)]
    out_shape = jax.ShapeDtypeStruct((M, n_out), x.dtype)

    if b is None:
        return pl.pallas_call(
            _matmul_kernel,
            out_shape=out_shape,
            grid=grid,
            in_specs=[x_spec, w_spec],
            out_specs=o_spec,
            scratch_shapes=scratch,
            compiler_params=cparams,
            cost_estimate=cost,
        )(x, wt)

    b_spec = pl.BlockSpec((1, tn), lambda i, j, k: (0, j))
    return pl.pallas_call(
        _matmul_bias_kernel,
        out_shape=out_shape,
        grid=grid,
        in_specs=[x_spec, w_spec, b_spec],
        out_specs=o_spec,
        scratch_shapes=scratch,
        compiler_params=cparams,
        cost_estimate=cost,
    )(x, wt, b.reshape(1, n_out))


# --------------------------------------------------------------------------- #
# Fused divided space-time attention kernel (CLS + per-frame spatial attention)
# --------------------------------------------------------------------------- #

def _make_attn_kernel(heads, dim_head, frames, patches, scale):
    H, D, F, P = heads, dim_head, frames, patches
    N = 1 + F * P
    FP = F * P
    HF = H * F
    inner = H * D

    def kernel(qkv_ref, o_ref):
        # qkv_ref block: (1, N, 3*inner) for one batch element, channels-last.
        full = qkv_ref[0]                                   # (N, 3*inner) f32
        q = full[:, 0 * inner:1 * inner]                    # (N, inner)
        k = full[:, 1 * inner:2 * inner]
        v = full[:, 2 * inner:3 * inner]

        # 'n (h d) -> h n d' via static lane slices + leading-axis stack
        def split_heads(t):
            return jnp.stack([t[:, h * D:(h + 1) * D] for h in range(H)], axis=0)

        qh = split_heads(q)                                 # (H, N, D) f32
        kh = split_heads(k)
        vh = split_heads(v)

        cls_k = kh[:, 0:1, :]                               # (H, 1, D) f32
        cls_v = vh[:, 0:1, :]

        # ---- CLS query attends over the full sequence (f32 VPU/XLU path) ----
        cls_q = qh[:, 0:1, :]                               # (H, 1, D)
        sim_c = jnp.sum(cls_q * kh, axis=-1, keepdims=True) * scale       # (H, N, 1)
        sim_c = sim_c - jnp.max(sim_c, axis=1, keepdims=True)
        e_c = jnp.exp(sim_c)
        inv_c = pl.reciprocal(jnp.sum(e_c, axis=1, keepdims=True), approx=True)
        cls_out = jnp.sum(e_c * vh, axis=1, keepdims=True) * inv_c        # (H, 1, D)

        # ---- frame-local spatial attention, batched over (head, frame) -------
        # Scores against the CLS key/value are added analytically (no
        # jnp.repeat / concat of cls_k, cls_v), computed ONCE for all F*P
        # patch queries.  The per-frame score/PV matmuls are fused into a
        # single (H*F)-batched einsum pair; reshapes split/merge the
        # second-minor dim only on 8-sublane boundaries (P is a multiple of 8).
        qp = qh[:, 1:, :]                                   # (H, FP, D) f32
        kp = kh[:, 1:, :]
        vp = vh[:, 1:, :]

        simc = jnp.sum(qp * cls_k, axis=-1, keepdims=True) * scale        # (H, FP, 1)

        qpf = qp.reshape(HF, P, D).astype(jnp.bfloat16)     # MXU operands
        kpf = kp.reshape(HF, P, D).astype(jnp.bfloat16)
        vpf = vp.reshape(HF, P, D).astype(jnp.bfloat16)

        sim = jnp.einsum("bqd,bkd->bqk", qpf, kpf,
                         preferred_element_type=jnp.float32)               # (HF,P,P)
        sim = sim.reshape(H, FP, P) * scale                                # (H,FP,P)

        m = jnp.maximum(jnp.max(sim, axis=-1, keepdims=True), simc)        # (H,FP,1)
        e = jnp.exp(sim - m)                                               # (H,FP,P)
        ec = jnp.exp(simc - m)                                             # (H,FP,1)
        inv = pl.reciprocal(jnp.sum(e, axis=-1, keepdims=True) + ec,
                            approx=True)                                   # (H,FP,1)

        pv = jnp.einsum("bqk,bkd->bqd",
                        e.reshape(HF, P, P).astype(jnp.bfloat16), vpf,
                        preferred_element_type=jnp.float32)                # (HF,P,D)
        out_p = (pv.reshape(H, FP, D) + ec * cls_v) * inv                  # (H,FP,D)

        out = jnp.concatenate([cls_out, out_p], axis=1)                    # (H, N, D)
        # 'h n d -> n (h d)': lane-dense output slab (inner-wide), feeds to_out
        o_ref[0] = jnp.concatenate([out[h] for h in range(H)],
                                   axis=-1).astype(o_ref.dtype)            # (N, inner)

    return kernel


def pallas_divided_attention(qkv, *, heads, dim_head, frames, patches, scale):
    """qkv: (B, N, 3*inner) from the qkv projection.  Returns (B, N, inner)."""
    B, N, _ = qkv.shape
    inner = heads * dim_head
    kernel = _make_attn_kernel(heads, dim_head, frames, patches, scale)
    flops = B * heads * (
        4 * N * dim_head
        + frames * (4 * patches * patches * dim_head + 2 * patches * dim_head)
    )
    cost = pl.CostEstimate(
        flops=flops,
        transcendentals=B * heads * (N + frames * patches * (patches + 1)),
        bytes_accessed=4 * (B * N * 3 * inner + B * N * inner),
    )
    return pl.pallas_call(
        kernel,
        out_shape=jax.ShapeDtypeStruct((B, N, inner), qkv.dtype),
        grid=(B,),
        in_specs=[pl.BlockSpec((1, N, 3 * inner), lambda b: (b, 0, 0))],
        out_specs=pl.BlockSpec((1, N, inner), lambda b: (b, 0, 0)),
        compiler_params=pltpu.CompilerParams(
            dimension_semantics=("parallel",),
            vmem_limit_bytes=_VMEM_LIMIT,
        ),
        cost_estimate=cost,
    )(qkv)


# --------------------------------------------------------------------------- #
# Full forward pass
# --------------------------------------------------------------------------- #

def attention_forward(x, w_qkv, w_out, b_out, *, heads, dim_head, frames):
    """Pallas-backed Attention.forward for the divided space-time usage
    (einops_from='b (f n) d', einops_to='(b f) n d', f=frames)."""
    b, n, dim = x.shape
    inner = heads * dim_head
    scale = dim_head ** (-0.5)
    if (n - 1) % frames != 0:
        raise ValueError("token count must be 1 + frames * patches")
    patches = (n - 1) // frames

    # to_qkv projection (tiled Pallas matmul, no bias)
    qkv = pallas_linear(x.reshape(b * n, dim), w_qkv)        # (b*n, 3*inner)
    qkv = qkv.reshape(b, n, 3 * inner)                       # free reshape, no transpose

    # fused CLS + per-frame attention; output is already in 'b n (h d)' layout
    out = pallas_divided_attention(
        qkv, heads=heads, dim_head=dim_head, frames=frames,
        patches=patches, scale=scale)

    # to_out: Linear(inner, dim) + Dropout(0.0) == identity
    out = pallas_linear(out.reshape(b * n, inner), w_out, b_out)
    return out.reshape(b, n, dim)


# --------------------------------------------------------------------------- #
# Pure-JAX reference (PyTorch semantics, all f32)
# --------------------------------------------------------------------------- #

def _ref_attn(q, k, v):
    sim = jnp.einsum("bid,bjd->bij", q, k)
    a = jax.nn.softmax(sim, axis=-1)
    return jnp.einsum("bij,bjd->bid", a, v)


def attention_forward_ref(x, w_qkv, w_out, b_out, *, heads, dim_head, frames):
    b, n, dim = x.shape
    inner = heads * dim_head
    scale = dim_head ** (-0.5)
    qkv = x @ w_qkv.T
    q, k, v = jnp.split(qkv, 3, axis=-1)
    to_heads = lambda t: (
        t.reshape(b, n, heads, dim_head).transpose(0, 2, 1, 3).reshape(b * heads, n, dim_head)
    )
    q, k, v = map(to_heads, (q, k, v))
    q = q * scale
    cls_q, q_ = q[:, :1], q[:, 1:]
    cls_k, k_ = k[:, :1], k[:, 1:]
    cls_v, v_ = v[:, :1], v[:, 1:]
    cls_out = _ref_attn(cls_q, k, v)
    p = (n - 1) // frames
    regroup = lambda t: t.reshape(b * heads, frames, p, dim_head).reshape(
        b * heads * frames, p, dim_head
    )
    q_, k_, v_ = map(regroup, (q_, k_, v_))
    r = q_.shape[0] // cls_k.shape[0]
    k_full = jnp.concatenate([jnp.repeat(cls_k, r, axis=0), k_], axis=1)
    v_full = jnp.concatenate([jnp.repeat(cls_v, r, axis=0), v_], axis=1)
    out = _ref_attn(q_, k_full, v_full)
    out = out.reshape(b * heads, frames, p, dim_head).reshape(b * heads, frames * p, dim_head)
    out = jnp.concatenate([cls_out, out], axis=1)
    out = out.reshape(b, heads, n, dim_head).transpose(0, 2, 1, 3).reshape(b, n, inner)
    return out @ w_out.T + b_out


# ----------------------------------- main ----------------------------------- #

if __name__ == "__main__":
    # Small shapes: batch=2, dim=64, heads=4, dim_head=32, frames=2, patches=8
    B, DIM, HEADS, DIM_HEAD, FRAMES, PATCHES = 2, 64, 4, 32, 2, 8
    N = 1 + FRAMES * PATCHES            # 17 tokens (CLS + f*p)
    INNER = HEADS * DIM_HEAD            # 128  -> lane-dense attention output

    key = jax.random.PRNGKey(0)
    k1, k2, k3, kx = jax.random.split(key, 4)

    # Deterministic parameter init (PyTorch nn.Linear-style uniform bounds)
    bound_qkv = 1.0 / math.sqrt(DIM)
    w_qkv = jax.random.uniform(
        k1, (3 * INNER, DIM), minval=-bound_qkv, maxval=bound_qkv, dtype=jnp.float32
    )
    bound_out = 1.0 / math.sqrt(INNER)
    w_out = jax.random.uniform(
        k2, (DIM, INNER), minval=-bound_out, maxval=bound_out, dtype=jnp.float32
    )
    b_out = jax.random.uniform(
        k3, (DIM,), minval=-bound_out, maxval=bound_out, dtype=jnp.float32
    )

    x = jax.random.normal(kx, (B, N, DIM), dtype=jnp.float32)

    fwd = jax.jit(functools.partial(
        attention_forward, heads=HEADS, dim_head=DIM_HEAD, frames=FRAMES))
    out = jax.block_until_ready(fwd(x, w_qkv, w_out, b_out))

    ref = attention_forward_ref(
        x, w_qkv, w_out, b_out, heads=HEADS, dim_head=DIM_HEAD, frames=FRAMES
    )
    # Tolerance reflects bf16 MXU operands (f32 accumulation) and the EUP
    # approximate reciprocal in the softmax; the reference is pure f32.
    np.testing.assert_allclose(np.asarray(out), np.asarray(ref), atol=3e-2, rtol=3e-2)

    print("KERNEL_OK")
</pallas_src>

<mosaic_0001>
module attributes {stable_mosaic.version = 11 : i64} {
  func.func @_matmul_kernel(%arg0: i32, %arg1: i32, %arg2: i32, %arg3: memref<34x64xf32, #tpu.memory_space<vmem>>, %arg4: memref<64x384xf32, #tpu.memory_space<vmem>>, %arg5: memref<34x384xf32, #tpu.memory_space<vmem>>, %arg6: memref<34x384xf32, #tpu.memory_space<vmem>>) attributes {dimension_semantics = [#tpu.dimension_semantics<parallel>, #tpu.dimension_semantics<parallel>, #tpu.dimension_semantics<arbitrary>], iteration_bounds = array<i64: 1, 1, 1>, scalar_prefetch = 0 : i64, scratch_operands = 1 : i64, tpu.core_type = #tpu.core_type<tc>, window_params = [{transform_indices = @transform_0, window_bounds = array<i64: 34, 64>}, {transform_indices = @transform_1, window_bounds = array<i64: 64, 384>}, {transform_indices = @transform_2, window_bounds = array<i64: 34, 384>}]} {
    %c0_i32 = arith.constant 0 : i32
    %0 = arith.cmpi eq, %arg2, %c0_i32 : i32
    %1 = arith.extui %0 : i1 to i32
    %c0_i32_0 = arith.constant 0 : i32
    %2 = arith.cmpi ne, %1, %c0_i32_0 : i32
    scf.if %2 {
      %cst_10 = arith.constant 0.000000e+00 : f32
      %14 = vector.broadcast %cst_10 : f32 to vector<34x384xf32>
      %c0_11 = arith.constant 0 : index
      %c0_12 = arith.constant 0 : index
      %15 = vector.load %arg6[%c0_11, %c0_12] : memref<34x384xf32, #tpu.memory_space<vmem>>, vector<34x384xf32>
      tpu.vector_store %arg6[%c0_11, %c0_12], %14 {strides = array<i32>} : memref<34x384xf32, #tpu.memory_space<vmem>>, vector<34x384xf32>,
    } else {
    }
    %c0 = arith.constant 0 : index
    %c0_1 = arith.constant 0 : index
    %3 = vector.load %arg6[%c0, %c0_1] : memref<34x384xf32, #tpu.memory_space<vmem>>, vector<34x384xf32>
    %c0_2 = arith.constant 0 : index
    %c0_3 = arith.constant 0 : index
    %4 = vector.load %arg3[%c0_2, %c0_3] : memref<34x64xf32, #tpu.memory_space<vmem>>, vector<34x64xf32>
    %5 = arith.truncf %4 : vector<34x64xf32> to vector<34x64xbf16>
    %c0_4 = arith.constant 0 : index
    %c0_5 = arith.constant 0 : index
    %6 = vector.load %arg4[%c0_4, %c0_5] : memref<64x384xf32, #tpu.memory_space<vmem>>, vector<64x384xf32>
    %7 = arith.truncf %6 : vector<64x384xf32> to vector<64x384xbf16>
    %cst = arith.constant dense<0.000000e+00> : vector<34x384xf32>
    %8 = tpu.matmul %5, %7, %cst {dimension_numbers = #tpu.dot_dimension_numbers<[1], [0], [0], [1], [0, 0, 1, 1], [], []>} : vector<34x64xbf16>, vector<64x384xbf16>, vector<34x384xf32> -> vector<34x384xf32>
    %9 = arith.addf %3, %8 : vector<34x384xf32>
    %c0_6 = arith.constant 0 : index
    %c0_7 = arith.constant 0 : index
    %10 = vector.load %arg6[%c0_6, %c0_7] : memref<34x384xf32, #tpu.memory_space<vmem>>, vector<34x384xf32>
    tpu.vector_store %arg6[%c0_6, %c0_7], %9 {strides = array<i32>} : memref<34x384xf32, #tpu.memory_space<vmem>>, vector<34x384xf32>,
    %c0_i32_8 = arith.constant 0 : i32
    %11 = arith.cmpi eq, %arg2, %c0_i32_8 : i32
    %12 = arith.extui %11 : i1 to i32
    %c0_i32_9 = arith.constant 0 : i32
    %13 = arith.cmpi ne, %12, %c0_i32_9 : i32
    scf.if %13 {
      %c0_10 = arith.constant 0 : index
      %c0_11 = arith.constant 0 : index
      %14 = vector.load %arg6[%c0_10, %c0_11] : memref<34x384xf32, #tpu.memory_space<vmem>>, vector<34x384xf32>
      %c0_12 = arith.constant 0 : index
      %c0_13 = arith.constant 0 : index
      %15 = vector.load %arg5[%c0_12, %c0_13] : memref<34x384xf32, #tpu.memory_space<vmem>>, vector<34x384xf32>
      tpu.vector_store %arg5[%c0_12, %c0_13], %14 {strides = array<i32>} : memref<34x384xf32, #tpu.memory_space<vmem>>, vector<34x384xf32>,
    } else {
    }
    return
  }
  func.func @transform_0(%arg0: i32, %arg1: i32, %arg2: i32) -> (i32, i32) {
    %c0_i32 = arith.constant 0 : i32
    return %arg0, %arg2 : i32, i32
  }
  func.func @transform_1(%arg0: i32, %arg1: i32, %arg2: i32) -> (i32, i32) {
    %c0_i32 = arith.constant 0 : i32
    return %arg2, %arg1 : i32, i32
  }
  func.func @transform_2(%arg0: i32, %arg1: i32, %arg2: i32) -> (i32, i32) {
    %c0_i32 = arith.constant 0 : i32
    return %arg0, %arg1 : i32, i32
  }
}

module attributes {stable_mosaic.version = 11 : i64} {
  func.func @_matmul_bias_kernel(%arg0: i32, %arg1: i32, %arg2: i32, %arg3: memref<34x128xf32, #tpu.memory_space<vmem>>, %arg4: memref<128x64xf32, #tpu.memory_space<vmem>>, %arg5: memref<1x64xf32, #tpu.memory_space<vmem>>, %arg6: memref<34x64xf32, #tpu.memory_space<vmem>>, %arg7: memref<34x64xf32, #tpu.memory_space<vmem>>) attributes {dimension_semantics = [#tpu.dimension_semantics<parallel>, #tpu.dimension_semantics<parallel>, #tpu.dimension_semantics<arbitrary>], iteration_bounds = array<i64: 1, 1, 1>, scalar_prefetch = 0 : i64, scratch_operands = 1 : i64, tpu.core_type = #tpu.core_type<tc>, window_params = [{transform_indices = @transform_0, window_bounds = array<i64: 34, 128>}, {transform_indices = @transform_1, window_bounds = array<i64: 128, 64>}, {transform_indices = @transform_2, window_bounds = array<i64: 1, 64>}, {transform_indices = @transform_3, window_bounds = array<i64: 34, 64>}]} {
    %c0_i32 = arith.constant 0 : i32
    %0 = arith.cmpi eq, %arg2, %c0_i32 : i32
    %1 = arith.extui %0 : i1 to i32
    %c0_i32_0 = arith.constant 0 : i32
    %2 = arith.cmpi ne, %1, %c0_i32_0 : i32
    scf.if %2 {
      %cst_10 = arith.constant 0.000000e+00 : f32
      %14 = vector.broadcast %cst_10 : f32 to vector<34x64xf32>
      %c0_11 = arith.constant 0 : index
      %c0_12 = arith.constant 0 : index
      %15 = vector.load %arg7[%c0_11, %c0_12] : memref<34x64xf32, #tpu.memory_space<vmem>>, vector<34x64xf32>
      tpu.vector_store %arg7[%c0_11, %c0_12], %14 {strides = array<i32>} : memref<34x64xf32, #tpu.memory_space<vmem>>, vector<34x64xf32>,
    } else {
    }
    %c0 = arith.constant 0 : index
    %c0_1 = arith.constant 0 : index
    %3 = vector.load %arg7[%c0, %c0_1] : memref<34x64xf32, #tpu.memory_space<vmem>>, vector<34x64xf32>
    %c0_2 = arith.constant 0 : index
    %c0_3 = arith.constant 0 : index
    %4 = vector.load %arg3[%c0_2, %c0_3] : memref<34x128xf32, #tpu.memory_space<vmem>>, vector<34x128xf32>
    %5 = arith.truncf %4 : vector<34x128xf32> to vector<34x128xbf16>
    %c0_4 = arith.constant 0 : index
    %c0_5 = arith.constant 0 : index
    %6 = vector.load %arg4[%c0_4, %c0_5] : memref<128x64xf32, #tpu.memory_space<vmem>>, vector<128x64xf32>
    %7 = arith.truncf %6 : vector<128x64xf32> to vector<128x64xbf16>
    %cst = arith.constant dense<0.000000e+00> : vector<34x64xf32>
    %8 = tpu.matmul %5, %7, %cst {dimension_numbers = #tpu.dot_dimension_numbers<[1], [0], [0], [1], [0, 0, 1, 1], [], []>} : vector<34x128xbf16>, vector<128x64xbf16>, vector<34x64xf32> -> vector<34x64xf32>
    %9 = arith.addf %3, %8 : vector<34x64xf32>
    %c0_6 = arith.constant 0 : index
    %c0_7 = arith.constant 0 : index
    %10 = vector.load %arg7[%c0_6, %c0_7] : memref<34x64xf32, #tpu.memory_space<vmem>>, vector<34x64xf32>
    tpu.vector_store %arg7[%c0_6, %c0_7], %9 {strides = array<i32>} : memref<34x64xf32, #tpu.memory_space<vmem>>, vector<34x64xf32>,
    %c0_i32_8 = arith.constant 0 : i32
    %11 = arith.cmpi eq, %arg2, %c0_i32_8 : i32
    %12 = arith.extui %11 : i1 to i32
    %c0_i32_9 = arith.constant 0 : i32
    %13 = arith.cmpi ne, %12, %c0_i32_9 : i32
    scf.if %13 {
      %c0_10 = arith.constant 0 : index
      %c0_11 = arith.constant 0 : index
      %14 = vector.load %arg7[%c0_10, %c0_11] : memref<34x64xf32, #tpu.memory_space<vmem>>, vector<34x64xf32>
      %c0_12 = arith.constant 0 : index
      %c0_13 = arith.constant 0 : index
      %15 = vector.load %arg5[%c0_12, %c0_13] : memref<1x64xf32, #tpu.memory_space<vmem>>, vector<1x64xf32>
      %16 = vector.broadcast %15 : vector<1x64xf32> to vector<34x64xf32>
      %17 = arith.addf %14, %16 : vector<34x64xf32>
      %c0_14 = arith.constant 0 : index
      %c0_15 = arith.constant 0 : index
      %18 = vector.load %arg6[%c0_14, %c0_15] : memref<34x64xf32, #tpu.memory_space<vmem>>, vector<34x64xf32>
      tpu.vector_store %arg6[%c0_14, %c0_15], %17 {strides = array<i32>} : memref<34x64xf32, #tpu.memory_space<vmem>>, vector<34x64xf32>,
    } else {
    }
    return
  }
  func.func @transform_0(%arg0: i32, %arg1: i32, %arg2: i32) -> (i32, i32) {
    %c0_i32 = arith.constant 0 : i32
    return %arg0, %arg2 : i32, i32
  }
  func.func @transform_1(%arg0: i32, %arg1: i32, %arg2: i32) -> (i32, i32) {
    %c0_i32 = arith.constant 0 : i32
    return %arg2, %arg1 : i32, i32
  }
  func.func @transform_2(%arg0: i32, %arg1: i32, %arg2: i32) -> (i32, i32) {
    %c0_i32 = arith.constant 0 : i32
    %c0_i32_0 = arith.constant 0 : i32
    return %c0_i32, %arg1 : i32, i32
  }
  func.func @transform_3(%arg0: i32, %arg1: i32, %arg2: i32) -> (i32, i32) {
    %c0_i32 = arith.constant 0 : i32
    return %arg0, %arg1 : i32, i32
  }
}

module attributes {stable_mosaic.version = 11 : i64} {
  func.func @kernel(%arg0: i32, %arg1: memref<1x17x384xf32, #tpu.memory_space<vmem>>, %arg2: memref<1x17x128xf32, #tpu.memory_space<vmem>>) attributes {dimension_semantics = [#tpu.dimension_semantics<parallel>], iteration_bounds = array<i64: 2>, scalar_prefetch = 0 : i64, scratch_operands = 0 : i64, tpu.core_type = #tpu.core_type<tc>, window_params = [{transform_indices = @transform_0, window_bounds = array<i64: 1, 17, 384>}, {transform_indices = @transform_1, window_bounds = array<i64: 1, 17, 128>}]} {
    %c0 = arith.constant 0 : index
    %c0_0 = arith.constant 0 : index
    %c0_1 = arith.constant 0 : index
    %0 = vector.load %arg1[%c0, %c0_0, %c0_1] : memref<1x17x384xf32, #tpu.memory_space<vmem>>, vector<1x17x384xf32>
    %1 = vector.shape_cast %0 : vector<1x17x384xf32> to vector<17x384xf32>
    %2 = vector.extract_strided_slice %1 {offsets = [0, 0], sizes = [17, 128], strides = [1, 1]} : vector<17x384xf32> to vector<17x128xf32>
    %3 = vector.extract_strided_slice %1 {offsets = [0, 128], sizes = [17, 128], strides = [1, 1]} : vector<17x384xf32> to vector<17x128xf32>
    %4 = vector.extract_strided_slice %1 {offsets = [0, 256], sizes = [17, 128], strides = [1, 1]} : vector<17x384xf32> to vector<17x128xf32>
    %5 = vector.extract_strided_slice %2 {offsets = [0, 0], sizes = [17, 32], strides = [1, 1]} : vector<17x128xf32> to vector<17x32xf32>
    %6 = vector.extract_strided_slice %2 {offsets = [0, 32], sizes = [17, 32], strides = [1, 1]} : vector<17x128xf32> to vector<17x32xf32>
    %7 = vector.extract_strided_slice %2 {offsets = [0, 64], sizes = [17, 32], strides = [1, 1]} : vector<17x128xf32> to vector<17x32xf32>
    %8 = vector.extract_strided_slice %2 {offsets = [0, 96], sizes = [17, 32], strides = [1, 1]} : vector<17x128xf32> to vector<17x32xf32>
    %9 = vector.shape_cast %5 : vector<17x32xf32> to vector<1x17x32xf32>
    %10 = vector.shape_cast %6 : vector<17x32xf32> to vector<1x17x32xf32>
    %11 = vector.shape_cast %7 : vector<17x32xf32> to vector<1x17x32xf32>
    %12 = vector.shape_cast %8 : vector<17x32xf32> to vector<1x17x32xf32>
    %13 = tpu.concatenate %9, %10, %11, %12 in 0 : vector<1x17x32xf32>, vector<1x17x32xf32>, vector<1x17x32xf32>, vector<1x17x32xf32> -> vector<4x17x32xf32>
    %14 = vector.extract_strided_slice %3 {offsets = [0, 0], sizes = [17, 32], strides = [1, 1]} : vector<17x128xf32> to vector<17x32xf32>
    %15 = vector.extract_strided_slice %3 {offsets = [0, 32], sizes = [17, 32], strides = [1, 1]} : vector<17x128xf32> to vector<17x32xf32>
    %16 = vector.extract_strided_slice %3 {offsets = [0, 64], sizes = [17, 32], strides = [1, 1]} : vector<17x128xf32> to vector<17x32xf32>
    %17 = vector.extract_strided_slice %3 {offsets = [0, 96], sizes = [17, 32], strides = [1, 1]} : vector<17x128xf32> to vector<17x32xf32>
    %18 = vector.shape_cast %14 : vector<17x32xf32> to vector<1x17x32xf32>
    %19 = vector.shape_cast %15 : vector<17x32xf32> to vector<1x17x32xf32>
    %20 = vector.shape_cast %16 : vector<17x32xf32> to vector<1x17x32xf32>
    %21 = vector.shape_cast %17 : vector<17x32xf32> to vector<1x17x32xf32>
    %22 = tpu.concatenate %18, %19, %20, %21 in 0 : vector<1x17x32xf32>, vector<1x17x32xf32>, vector<1x17x32xf32>, vector<1x17x32xf32> -> vector<4x17x32xf32>
    %23 = vector.extract_strided_slice %4 {offsets = [0, 0], sizes = [17, 32], strides = [1, 1]} : vector<17x128xf32> to vector<17x32xf32>
    %24 = vector.extract_strided_slice %4 {offsets = [0, 32], sizes = [17, 32], strides = [1, 1]} : vector<17x128xf32> to vector<17x32xf32>
    %25 = vector.extract_strided_slice %4 {offsets = [0, 64], sizes = [17, 32], strides = [1, 1]} : vector<17x128xf32> to vector<17x32xf32>
    %26 = vector.extract_strided_slice %4 {offsets = [0, 96], sizes = [17, 32], strides = [1, 1]} : vector<17x128xf32> to vector<17x32xf32>
    %27 = vector.shape_cast %23 : vector<17x32xf32> to vector<1x17x32xf32>
    %28 = vector.shape_cast %24 : vector<17x32xf32> to vector<1x17x32xf32>
    %29 = vector.shape_cast %25 : vector<17x32xf32> to vector<1x17x32xf32>
    %30 = vector.shape_cast %26 : vector<17x32xf32> to vector<1x17x32xf32>
    %31 = tpu.concatenate %27, %28, %29, %30 in 0 : vector<1x17x32xf32>, vector<1x17x32xf32>, vector<1x17x32xf32>, vector<1x17x32xf32> -> vector<4x17x32xf32>
    %32 = vector.extract_strided_slice %22 {offsets = [0, 0, 0], sizes = [4, 1, 32], strides = [1, 1, 1]} : vector<4x17x32xf32> to vector<4x1x32xf32>
    %33 = vector.extract_strided_slice %31 {offsets = [0, 0, 0], sizes = [4, 1, 32], strides = [1, 1, 1]} : vector<4x17x32xf32> to vector<4x1x32xf32>
    %34 = vector.extract_strided_slice %13 {offsets = [0, 0, 0], sizes = [4, 1, 32], strides = [1, 1, 1]} : vector<4x17x32xf32> to vector<4x1x32xf32>
    %35 = vector.broadcast %34 : vector<4x1x32xf32> to vector<4x17x32xf32>
    %36 = arith.mulf %35, %22 : vector<4x17x32xf32>
    %cst = arith.constant dense<0.000000e+00> : vector<4x17xf32>
    %37 = vector.multi_reduction <add>, %36, %cst [2] : vector<4x17x32xf32> to vector<4x17xf32>
    %38 = vector.shape_cast %37 : vector<4x17xf32> to vector<4x17x1xf32>
    %cst_2 = arith.constant 0.176776692 : f32
    %39 = vector.broadcast %cst_2 : f32 to vector<4x17x1xf32>
    %40 = arith.mulf %38, %39 : vector<4x17x1xf32>
    %cst_3 = arith.constant dense<0xFF800000> : vector<4x1xf32>
    %41 = vector.multi_reduction <maximumf>, %40, %cst_3 [1] : vector<4x17x1xf32> to vector<4x1xf32>
    %42 = vector.shape_cast %41 : vector<4x1xf32> to vector<4x1x1xf32>
    %43 = vector.broadcast %42 : vector<4x1x1xf32> to vector<4x17x1xf32>
    %44 = arith.subf %40, %43 : vector<4x17x1xf32>
    %45 = math.exp %44 : vector<4x17x1xf32>
    %cst_4 = arith.constant dense<0.000000e+00> : vector<4x1xf32>
    %46 = vector.multi_reduction <add>, %45, %cst_4 [1] : vector<4x17x1xf32> to vector<4x1xf32>
    %47 = vector.shape_cast %46 : vector<4x1xf32> to vector<4x1x1xf32>
    %48 = tpu.reciprocal %47 {approx = true} : vector<4x1x1xf32> -> vector<4x1x1xf32>
    %49 = vector.broadcast %45 : vector<4x17x1xf32> to vector<4x17x32xf32>
    %50 = arith.mulf %49, %31 : vector<4x17x32xf32>
    %cst_5 = arith.constant dense<0.000000e+00> : vector<4x32xf32>
    %51 = vector.multi_reduction <add>, %50, %cst_5 [1] : vector<4x17x32xf32> to vector<4x32xf32>
    %52 = vector.shape_cast %51 : vector<4x32xf32> to vector<4x1x32xf32>
    %53 = vector.broadcast %48 : vector<4x1x1xf32> to vector<4x1x32xf32>
    %54 = arith.mulf %52, %53 : vector<4x1x32xf32>
    %55 = vector.extract_strided_slice %13 {offsets = [0, 1, 0], sizes = [4, 16, 32], strides = [1, 1, 1]} : vector<4x17x32xf32> to vector<4x16x32xf32>
    %56 = vector.extract_strided_slice %22 {offsets = [0, 1, 0], sizes = [4, 16, 32], strides = [1, 1, 1]} : vector<4x17x32xf32> to vector<4x16x32xf32>
    %57 = vector.extract_strided_slice %31 {offsets = [0, 1, 0], sizes = [4, 16, 32], strides = [1, 1, 1]} : vector<4x17x32xf32> to vector<4x16x32xf32>
    %58 = vector.broadcast %32 : vector<4x1x32xf32> to vector<4x16x32xf32>
    %59 = arith.mulf %55, %58 : vector<4x16x32xf32>
    %cst_6 = arith.constant dense<0.000000e+00> : vector<4x16xf32>
    %60 = vector.multi_reduction <add>, %59, %cst_6 [2] : vector<4x16x32xf32> to vector<4x16xf32>
    %61 = vector.shape_cast %60 : vector<4x16xf32> to vector<4x16x1xf32>
    %cst_7 = arith.constant 0.176776692 : f32
    %62 = vector.broadcast %cst_7 : f32 to vector<4x16x1xf32>
    %63 = arith.mulf %61, %62 : vector<4x16x1xf32>
    %64 = vector.shape_cast %55 : vector<4x16x32xf32> to vector<8x8x32xf32>
    %65 = arith.truncf %64 : vector<8x8x32xf32> to vector<8x8x32xbf16>
    %66 = vector.shape_cast %56 : vector<4x16x32xf32> to vector<8x8x32xf32>
    %67 = arith.truncf %66 : vector<8x8x32xf32> to vector<8x8x32xbf16>
    %68 = vector.shape_cast %57 : vector<4x16x32xf32> to vector<8x8x32xf32>
    %69 = arith.truncf %68 : vector<8x8x32xf32> to vector<8x8x32xbf16>
    "tpu.trace_start"() <{level = 10 : i32, message = "bqd,bkd->bqk"}> : () -> ()
    %cst_8 = arith.constant dense<0.000000e+00> : vector<8x8x8xf32>
    %70 = tpu.matmul %65, %67, %cst_8 {dimension_numbers = #tpu.dot_dimension_numbers<[2], [2], [1], [1], [0, 0, 0, 1, 1, 1], [0], [0]>} : vector<8x8x32xbf16>, vector<8x8x32xbf16>, vector<8x8x8xf32> -> vector<8x8x8xf32>
    "tpu.trace_stop"() : () -> ()
    %71 = vector.shape_cast %70 : vector<8x8x8xf32> to vector<4x16x8xf32>
    %cst_9 = arith.constant 0.176776692 : f32
    %72 = vector.broadcast %cst_9 : f32 to vector<4x16x8xf32>
    %73 = arith.mulf %71, %72 : vector<4x16x8xf32>
    %cst_10 = arith.constant dense<0xFF800000> : vector<4x16xf32>
    %74 = vector.multi_reduction <maximumf>, %73, %cst_10 [2] : vector<4x16x8xf32> to vector<4x16xf32>
    %75 = vector.shape_cast %74 : vector<4x16xf32> to vector<4x16x1xf32>
    %76 = arith.maximumf %75, %63 : vector<4x16x1xf32>
    %77 = vector.broadcast %76 : vector<4x16x1xf32> to vector<4x16x8xf32>
    %78 = arith.subf %73, %77 : vector<4x16x8xf32>
    %79 = math.exp %78 : vector<4x16x8xf32>
    %80 = arith.subf %63, %76 : vector<4x16x1xf32>
    %81 = math.exp %80 : vector<4x16x1xf32>
    %cst_11 = arith.constant dense<0.000000e+00> : vector<4x16xf32>
    %82 = vector.multi_reduction <add>, %79, %cst_11 [2] : vector<4x16x8xf32> to vector<4x16xf32>
    %83 = vector.shape_cast %82 : vector<4x16xf32> to vector<4x16x1xf32>
    %84 = arith.addf %83, %81 : vector<4x16x1xf32>
    %85 = tpu.reciprocal %84 {approx = true} : vector<4x16x1xf32> -> vector<4x16x1xf32>
    %86 = vector.shape_cast %79 : vector<4x16x8xf32> to vector<8x8x8xf32>
    %87 = arith.truncf %86 : vector<8x8x8xf32> to vector<8x8x8xbf16>
    "tpu.trace_start"() <{level = 10 : i32, message = "bqk,bkd->bqd"}> : () -> ()
    %cst_12 = arith.constant dense<0.000000e+00> : vector<8x8x32xf32>
    %88 = tpu.matmul %87, %69, %cst_12 {dimension_numbers = #tpu.dot_dimension_numbers<[2], [1], [1], [2], [0, 0, 0, 1, 1, 2], [0], [0]>} : vector<8x8x8xbf16>, vector<8x8x32xbf16>, vector<8x8x32xf32> -> vector<8x8x32xf32>
    "tpu.trace_stop"() : () -> ()
    %89 = vector.shape_cast %88 : vector<8x8x32xf32> to vector<4x16x32xf32>
    %90 = vector.broadcast %81 : vector<4x16x1xf32> to vector<4x16x32xf32>
    %91 = vector.broadcast %33 : vector<4x1x32xf32> to vector<4x16x32xf32>
    %92 = arith.mulf %90, %91 : vector<4x16x32xf32>
    %93 = arith.addf %89, %92 : vector<4x16x32xf32>
    %94 = vector.broadcast %85 : vector<4x16x1xf32> to vector<4x16x32xf32>
    %95 = arith.mulf %93, %94 : vector<4x16x32xf32>
    %96 = tpu.concatenate %54, %95 in 1 : vector<4x1x32xf32>, vector<4x16x32xf32> -> vector<4x17x32xf32>
    %97 = vector.extract_strided_slice %96 {offsets = [0, 0, 0], sizes = [1, 17, 32], strides = [1, 1, 1]} : vector<4x17x32xf32> to vector<1x17x32xf32>
    %98 = vector.shape_cast %97 : vector<1x17x32xf32> to vector<17x32xf32>
    %99 = vector.extract_strided_slice %96 {offsets = [1, 0, 0], sizes = [1, 17, 32], strides = [1, 1, 1]} : vector<4x17x32xf32> to vector<1x17x32xf32>
    %100 = vector.shape_cast %99 : vector<1x17x32xf32> to vector<17x32xf32>
    %101 = vector.extract_strided_slice %96 {offsets = [2, 0, 0], sizes = [1, 17, 32], strides = [1, 1, 1]} : vector<4x17x32xf32> to vector<1x17x32xf32>
    %102 = vector.shape_cast %101 : vector<1x17x32xf32> to vector<17x32xf32>
    %103 = vector.extract_strided_slice %96 {offsets = [3, 0, 0], sizes = [1, 17, 32], strides = [1, 1, 1]} : vector<4x17x32xf32> to vector<1x17x32xf32>
    %104 = vector.shape_cast %103 : vector<1x17x32xf32> to vector<17x32xf32>
    %105 = tpu.concatenate %98, %100, %102, %104 in 1 : vector<17x32xf32>, vector<17x32xf32>, vector<17x32xf32>, vector<17x32xf32> -> vector<17x128xf32>
    %c0_13 = arith.constant 0 : index
    %c0_14 = arith.constant 0 : index
    %c0_15 = arith.constant 0 : index
    %106 = vector.load %arg2[%c0_13, %c0_14, %c0_15] : memref<1x17x128xf32, #tpu.memory_space<vmem>>, vector<1x17x128xf32>
    %107 = vector.shape_cast %106 : vector<1x17x128xf32> to vector<17x128xf32>
    %108 = vector.shape_cast %105 : vector<17x128xf32> to vector<1x17x128xf32>
    tpu.vector_store %arg2[%c0_13, %c0_14, %c0_15], %108 {strides = array<i32>} : memref<1x17x128xf32, #tpu.memory_space<vmem>>, vector<1x17x128xf32>,
    return
  }
  func.func @transform_0(%arg0: i32) -> (i32, i32, i32) {
    %c0_i32 = arith.constant 0 : i32
    %c0_i32_0 = arith.constant 0 : i32
    %c0_i32_1 = arith.constant 0 : i32
    return %arg0, %c0_i32, %c0_i32_0 : i32, i32, i32
  }
  func.func @transform_1(%arg0: i32) -> (i32, i32, i32) {
    %c0_i32 = arith.constant 0 : i32
    %c0_i32_0 = arith.constant 0 : i32
    %c0_i32_1 = arith.constant 0 : i32
    return %arg0, %c0_i32, %c0_i32_0 : i32, i32, i32
  }
}

</mosaic_0001>

<bundles_post_ra>
// kernel: attention_forward.5
= control target key start
LH: loop header
LB: loop body
LE: loop exit
PB: predicated region body
PF: predicated region fallthrough
CT: control target
= control target key end

     0   :  { %vm19_vm0 = vcmask 523264   ;;  %v218_v0 = vmov 0.0   ;;  %vm219_vm1 = vmmov 0   ;;  %vm24_vm2 = vcmask 517120   ;;  %s363_s1 = inlined_call_operand.vmem [shape: f32[128,64], index: 1, kind: input, shape index: {}]   ;;  %s364_s0 = inlined_call_operand.vmem [shape: f32[34,128], index: 0, kind: input, shape index: {}]   ;;  %s365_s2 = inlined_call_operand.vmem [shape: f32[1,64], index: 2, kind: input, shape index: {}]   ;;  %s366_s3 = inlined_call_operand.vmem [shape: f32[34,64], index: 3, kind: output, shape index: {}]  }
   0x1   :  { %200 = vmatprep.subr.bf16.mxu1 %v218_v0  ;;  %v39_v1 = vld [vmem:[%s363_s1] sm:$0xff]  ;;  %v40_v2 = vld [vmem:[%s363_s1 + $0x8] sm:$0xff]  ;;  %172 = vmatprep.subr.bf16.mxu0 %v218_v0  ;;  %v41_v3 = vld [vmem:[%s363_s1 + $0x10] sm:$0xff]  ;;  %22 = vst.msk [vmem:[#allocation2 + $0x10] sm:$0xff] %vm19_vm0, %v218_v0 }
   0x2   :  { %20 = vst.msk [vmem:[#allocation2] sm:$0xff] %vm19_vm0, %v218_v0  ;;  %21 = vst.msk [vmem:[#allocation2 + $0x8] sm:$0xff] %vm19_vm0, %v218_v0  ;;  %v55_v4 = vpack.c.bf16 %v40_v2, %v39_v1  ;;  %v42_v5 = vld [vmem:[%s363_s1 + $0x18] sm:$0xff]  ;;  %192 = vmatprep.mubr.msk.bf16.mxu1 %vm219_vm1, %v218_v0  ;;  %188 = vmatprep.mubr.msk.bf16.mxu0 %vm219_vm1, %v218_v0  ;;  %v43_v7 = vld [vmem:[%s363_s1 + $0x20] sm:$0xff] }
   0x3   :  { %23 = vst.msk [vmem:[#allocation2 + $0x18] sm:$0xff] %vm19_vm0, %v218_v0  ;;  %v56_v6 = vpack.c.bf16 %v42_v5, %v41_v3  ;;  %v44_v8 = vld [vmem:[%s363_s1 + $0x28] sm:$0xff]  ;;  %v45_v10 = vld [vmem:[%s363_s1 + $0x30] sm:$0xff]  ;;  %v46_v11 = vld [vmem:[%s363_s1 + $0x38] sm:$0xff] }
   0x4   :  { %208 = vmatpush3.bf16.msra.mxu1 %v55_v4  ;;  %173 = vmatpush3.bf16.msra.mxu0 %v55_v4  ;;  %v57_v9 = vpack.c.bf16 %v44_v8, %v43_v7  ;;  %v58_v12 = vpack.c.bf16 %v46_v11, %v45_v10  ;;  %v47_v13 = vld [vmem:[%s363_s1 + $0x40] sm:$0xff]  ;;  %v48_v14 = vld [vmem:[%s363_s1 + $0x48] sm:$0xff]  ;;  %v49_v16 = vld [vmem:[%s363_s1 + $0x50] sm:$0xff]  ;;  %25 = vst.msk [vmem:[#allocation2 + $0x20] sm:$0x3] %vm24_vm2, %v218_v0 }
   0x5   :  { %201 = vmatprep.subr.bf16.mxu1 %v218_v0  ;;  %174 = vmatprep.subr.bf16.mxu0 %v218_v0  ;;  %v59_v15 = vpack.c.bf16 %v48_v14, %v47_v13  ;;  %v50_v17 = vld [vmem:[%s363_s1 + $0x58] sm:$0xff]  ;;  %v51_v19 = vld [vmem:[%s363_s1 + $0x60] sm:$0xff]  ;;  %v52_v20 = vld [vmem:[%s363_s1 + $0x68] sm:$0xff] }
   0x6   :  { %v60_v18 = vpack.c.bf16 %v50_v17, %v49_v16  ;;  %v61_v21 = vpack.c.bf16 %v52_v20, %v51_v19  ;;  %v53_v22 = vld [vmem:[%s363_s1 + $0x70] sm:$0xff]  ;;  %v54_v23 = vld [vmem:[%s363_s1 + $0x78] sm:$0xff]  ;;  %v31_v27 = vld [vmem:[%s364_s0] sm:$0xff] }
   0x7   :  { %v33_v24 = vld [vmem:[%s364_s0 + $0x10] sm:$0xff]  ;;  %v62_v25 = vpack.c.bf16 %v54_v23, %v53_v22  ;;  %v34_v26 = vld [vmem:[%s364_s0 + $0x18] sm:$0xff]  ;;  %v32_v28 = vld [vmem:[%s364_s0 + $0x8] sm:$0xff] }
   0x8   :  { %209 = vmatpush3.bf16.msra.mxu1 %v56_v6  ;;  %175 = vmatpush3.bf16.msra.mxu0 %v56_v6  ;;  %v37_v29 = vpack.c.bf16 %v34_v26, %v33_v24  ;;  %v36_v30 = vpack.c.bf16 %v32_v28, %v31_v27  ;;  %v35_v31 = vld [vmem:[%s364_s0 + $0x20] sm:$0x3]  ;;  %v28_v33 = vld [vmem:[#allocation2 + $0x10] sm:$0xff] }
   0x9   :  { %202 = vmatprep.subr.bf16.mxu1 %v218_v0  ;;  %176 = vmatprep.subr.bf16.mxu0 %v218_v0  ;;  %v38_v32 = vpack.c.bf16 %v35_v31, %v35_v31  ;;  %v26_v34 = vld [vmem:[#allocation2] sm:$0xff]  ;;  %v27_v38 = vld [vmem:[#allocation2 + $0x8] sm:$0xff] }
   0xa   :  { %v29_v36 = vld [vmem:[#allocation2 + $0x18] sm:$0xff]  ;;  %v160_v51 = vld [vmem:[%s365_s2] ss:$0 sm:$0xff] }
   0xb   :  { %v30_v49 = vld [vmem:[#allocation2 + $0x20] sm:$0x3] }
   0xc   :  { %210 = vmatpush3.bf16.msra.mxu1 %v57_v9  ;;  %177 = vmatpush3.bf16.msra.mxu0 %v57_v9 }
   0xd   :  { %203 = vmatprep.subr.bf16.mxu1 %v218_v0  ;;  %178 = vmatprep.subr.bf16.mxu0 %v218_v0 }
  0x10   :  { %211 = vmatpush3.bf16.msra.mxu1 %v58_v12  ;;  %179 = vmatpush3.bf16.msra.mxu0 %v58_v12 }
  0x11   :  { %204 = vmatprep.subr.bf16.mxu1 %v218_v0  ;;  %180 = vmatprep.subr.bf16.mxu0 %v218_v0 }
  0x14   :  { %212 = vmatpush3.bf16.msra.mxu1 %v59_v15  ;;  %181 = vmatpush3.bf16.msra.mxu0 %v59_v15 }
  0x15   :  { %205 = vmatprep.subr.bf16.mxu1 %v218_v0  ;;  %182 = vmatprep.subr.bf16.mxu0 %v218_v0 }
  0x18   :  { %213 = vmatpush3.bf16.msra.mxu1 %v60_v18  ;;  %183 = vmatpush3.bf16.msra.mxu0 %v60_v18 }
  0x19   :  { %206 = vmatprep.subr.bf16.mxu1 %v218_v0  ;;  %184 = vmatprep.subr.bf16.mxu0 %v218_v0 }
  0x1c   :  { %214 = vmatpush3.bf16.msra.mxu1 %v61_v21  ;;  %185 = vmatpush3.bf16.msra.mxu0 %v61_v21 }
  0x1d   :  { %207 = vmatprep.subr.bf16.mxu1 %v218_v0  ;;  %186 = vmatprep.subr.bf16.mxu0 %v218_v0 }
  0x20   :  { %215 = vmatpush3.bf16.msra.mxu1 %v62_v25  ;;  %187 = vmatpush3.bf16.msra.mxu0 %v62_v25 }
  0x23   :  { %193 = vmatmul.mubr.bf16.vlgmr.msra.gmra.mrb[0].mxu1 %v37_v29  ;;  %189 = vmatmul.mubr.bf16.vlgmr.msra.gmra.mrb[0].mxu0 %v36_v30 }
  0x24   :  { %196 = vmatprep.mubr.msk.bf16.mxu1 %vm219_vm1, %v218_v0 }
  0x2b   :  { %197 = vmatmul.mubr.bf16.gmra.mrb[4].mxu1 %v38_v32 }
  0xf6   :  { %v105_v35 = vpop.f32.mrb[0].mxu1  ;;  %v97_v37 = vpop.f32.mrb[0].mxu0 }
  0xf7   :  { %v121_v39 = vadd.f32 %v105_v35, %v28_v33  ;;  %v194_v40 = vpop.f32.mrb[1].mxu1  ;;  %v119_v41 = vadd.f32 %v97_v37, %v26_v34  ;;  %v190_v42 = vpop.f32.mrb[1].mxu0 }
  0xf8   :  { %v108_v43 = vpop.f32.mrb[2].mxu1  ;;  %v100_v44 = vpop.f32.mrb[2].mxu0 }
  0xf9   :  { %127 = vst.msk [vmem:[#allocation2 + $0x10] sm:$0xff] %vm19_vm0, %v121_v39  ;;  %v122_v45 = vadd.f32 %v108_v43, %v29_v36  ;;  %125 = vst.msk [vmem:[#allocation2] sm:$0xff] %vm19_vm0, %v119_v41  ;;  %v195_v46 = vpop.f32.mrb[3].mxu1  ;;  %v120_v47 = vadd.f32 %v100_v44, %v27_v38  ;;  %v191_v48 = vpop.f32.mrb[3].mxu0 }
  0xfb   :  { %128 = vst.msk [vmem:[#allocation2 + $0x18] sm:$0xff] %vm19_vm0, %v122_v45  ;;  %126 = vst.msk [vmem:[#allocation2 + $0x8] sm:$0xff] %vm19_vm0, %v120_v47 }
  0xfe   :  { %v113_v50 = vpop.f32.mrb[4].mxu1 }
  0xff   :  { %v123_v52 = vadd.f32 %v113_v50, %v30_v49  ;;  %v198_v53 = vpop.f32.mrb[5].mxu1 }
 0x100   :  { %v134_v54 = vld [vmem:[#allocation2] sm:$0xff]  ;;  %v136_v55 = vld [vmem:[#allocation2 + $0x10] sm:$0xff]  ;;  %v116_v56 = vpop.f32.mrb[6].mxu1 }
 0x101   :  { %130 = vst.msk [vmem:[#allocation2 + $0x20] sm:$0x3] %vm24_vm2, %v123_v52  ;;  %v146_v57 = vadd.f32 %v160_v51, %v134_v54  ;;  %v148_v58 = vadd.f32 %v160_v51, %v136_v55  ;;  %v199_v59 = vpop.f32.mrb[7].mxu1 }
 0x102   :  { %v135_v60 = vld [vmem:[#allocation2 + $0x8] sm:$0xff]  ;;  %v137_v61 = vld [vmem:[#allocation2 + $0x18] sm:$0xff] }
 0x103   :  { %v147_v62 = vadd.f32 %v160_v51, %v135_v60  ;;  %v149_v63 = vadd.f32 %v160_v51, %v137_v61  ;;  %151 = vst.msk [vmem:[%s366_s3] sm:$0xff] %vm19_vm0, %v146_v57  ;;  %153 = vst.msk [vmem:[%s366_s3 + $0x10] sm:$0xff] %vm19_vm0, %v148_v58 }
 0x105   :  { %152 = vst.msk [vmem:[%s366_s3 + $0x8] sm:$0xff] %vm19_vm0, %v147_v62  ;;  %154 = vst.msk [vmem:[%s366_s3 + $0x18] sm:$0xff] %vm19_vm0, %v149_v63 }
 0x108   :  { %v138_v0 = vld [vmem:[#allocation2 + $0x20] sm:$0x3] }
 0x109   :  { %v150_v1 = vadd.f32 %v160_v51, %v138_v0 }
 0x10b   :  { %155 = vst.msk [vmem:[%s366_s3 + $0x20] sm:$0x3] %vm24_vm2, %v150_v1 }

// kernel: attention_forward.3
= control target key start
LH: loop header
LB: loop body
LE: loop exit
PB: predicated region body
PF: predicated region fallthrough
CT: control target
= control target key end

     0   :  { %7 = vsyncpa [#allocation4], 0  ;;  %s362_s9 = smov [#allocation3]   ;;  %s471_s0 = inlined_call_operand.vmem [shape: f32[34,64], index: 0, kind: input, shape index: {}]   ;;  %s472_s1 = inlined_call_operand.hbm [shape: f32[64,384], index: 1, kind: input, shape index: {}]   ;;  %s473_s2 = inlined_call_operand.vmem [shape: f32[34,384], index: 2, kind: output, shape index: {}]  }
   0x1   :  { %s15_s10 = sshll.u32 %s362_s9, 4  ;;  %s338_s13 = scalar_lea.hbm %s472_s1, 3072  ;;  %s16_s10 = int_to_ptr.vmem [resolvable:$true] %s15_s10 }
   0x2   :  { %p339_p0 = scmp.ne.s32.totalorder %s472_s1, %s338_s13  ;;  %p342_p1 = scmp.lt.u32.totalorder %s338_s13, %s472_s1 }
   0x4   :  { %p344_p2 = pnand %p342_p1, %p339_p0 }
   0x6   :  { %347 = shalt.err (!%p344_p2)
}
   0x7   :  { %s348_s18 = scalar_lea.vmem %s16_s10, 3072  ;;  %p353_p4 = scmp.lt.s32.totalorder %s16_s10, %s16_s10 }
   0x8   :  { %p349_p3 = scmp.ne.s32.totalorder %s16_s10, %s348_s18  ;;  %p354_p5 = scmp.lt.s32.totalorder %s348_s18, %s348_s18 }
   0xa   :  { %p355_p6 = por %p354_p5, %p353_p4 }
   0xc   :  { %p356_p7 = pnand %p355_p6, %p349_p3 }
   0xe   :  { %359 = shalt.err (!%p356_p7)
}
   0xf   :  { %s363_s19 = smov 384   ;;  %s364_s20 = smov 24  }
  0x10   :  { %21 = dma.hbm_to_vmem [thread:$0]  %s472_s1, 3072, %s16_s10, [#allocation4], %s363_s19, %s363_s19, %s364_s20  }
  0x11   :  { %360 = dma.done.wait [#allocation4], 3072  }
  0x12   :  { %361 = vsyncadd [#allocation4], 4294964224  ;;  %v365_v0 = vmov 0.0   ;;  %vm366_vm0 = vmmov 0   ;;  %v367_v1 = vmov 0   ;;  %v69_v2 = vld [vmem:[#allocation3 + $0x8] sm:$0xff] }
  0x13   :  { %312 = vmatprep.subr.bf16.mxu1 %v365_v0  ;;  %42 = vst [vmem:[#allocation2 + $0x60] sm:$0x3] %v365_v0  ;;  %43 = vst [vmem:[#allocation2 + $0x68] sm:$0x3] %v365_v0  ;;  %320 = vmatprep.mubr.msk.bf16.mxu1 %vm366_vm0, %v365_v0  ;;  %v72_v3 = vld [vmem:[#allocation3 + $0x20] sm:$0xff]  ;;  %v70_v4 = vld [vmem:[#allocation3 + $0x10] sm:$0xff] }
  0x14   :  { %44 = vst [vmem:[#allocation2 + $0x70] sm:$0x3] %v365_v0  ;;  %146 = vmatprep.mubr.bf16.mxu0 %v367_v1  ;;  %v93_v5 = vpack.c.bf16 %v72_v3, %v69_v2  ;;  %v73_v6 = vld [vmem:[#allocation3 + $0x28] sm:$0xff]  ;;  %v68_v7 = vld [vmem:[#allocation3] sm:$0xff]  ;;  %v71_v8 = vld [vmem:[#allocation3 + $0x18] sm:$0xff]  ;;  %vm104_vm1 = vcmask 523264  }
  0x15   :  { %v94_v9 = vpack.c.bf16 %v73_v6, %v70_v4  ;;  %v92_v10 = vpack.c.bf16 %v71_v8, %v68_v7  ;;  %v75_v11 = vld [vmem:[#allocation3 + $0x38] sm:$0xff]  ;;  %v78_v12 = vld [vmem:[#allocation3 + $0x50] sm:$0xff]  ;;  %v76_v13 = vld [vmem:[#allocation3 + $0x40] sm:$0xff] }
  0x16   :  { %114 = vmatprep.subr.bf16.mxu0 %v93_v5  ;;  %v96_v14 = vpack.c.bf16 %v78_v12, %v75_v11  ;;  %v79_v15 = vld [vmem:[#allocation3 + $0x58] sm:$0xff]  ;;  %v74_v16 = vld [vmem:[#allocation3 + $0x30] sm:$0xff]  ;;  %v77_v17 = vld [vmem:[#allocation3 + $0x48] sm:$0xff] }
  0x17   :  { %313 = vmatpush3.bf16.msra.mxu1 %v94_v9  ;;  %115 = vmatpush1.bf16.msra.mxu0 %v92_v10  ;;  %v97_v18 = vpack.c.bf16 %v79_v15, %v76_v13  ;;  %v95_v19 = vpack.c.bf16 %v77_v17, %v74_v16  ;;  %v81_v20 = vld [vmem:[#allocation3 + $0x68] sm:$0xff]  ;;  %v84_v21 = vld [vmem:[#allocation3 + $0x80] sm:$0xff]  ;;  %v82_v22 = vld [vmem:[#allocation3 + $0x70] sm:$0xff] }
  0x18   :  { %314 = vmatprep.subr.bf16.mxu1 %v365_v0  ;;  %116 = vmatprep.subr.bf16.mxu0 %v96_v14  ;;  %v99_v23 = vpack.c.bf16 %v84_v21, %v81_v20  ;;  %v85_v24 = vld [vmem:[#allocation3 + $0x88] sm:$0xff]  ;;  %v80_v25 = vld [vmem:[#allocation3 + $0x60] sm:$0xff]  ;;  %v83_v26 = vld [vmem:[#allocation3 + $0x78] sm:$0xff] }
  0x19   :  { %v87_v27 = vld [vmem:[#allocation3 + $0x98] sm:$0xff]  ;;  %v90_v28 = vld [vmem:[#allocation3 + $0xb0] sm:$0xff]  ;;  %v100_v29 = vpack.c.bf16 %v85_v24, %v82_v22  ;;  %v98_v30 = vpack.c.bf16 %v83_v26, %v80_v25  ;;  %v88_v31 = vld [vmem:[#allocation3 + $0xa0] sm:$0xff] }
  0x1a   :  { %v102_v32 = vpack.c.bf16 %v90_v28, %v87_v27  ;;  %v91_v33 = vld [vmem:[#allocation3 + $0xb8] sm:$0xff]  ;;  %v86_v34 = vld [vmem:[#allocation3 + $0x90] sm:$0xff]  ;;  %v89_v35 = vld [vmem:[#allocation3 + $0xa8] sm:$0xff] }
  0x1b   :  { %315 = vmatpush3.bf16.msra.mxu1 %v97_v18  ;;  %117 = vmatpush1.bf16.msra.mxu0 %v95_v19  ;;  %v103_v36 = vpack.c.bf16 %v91_v33, %v88_v31  ;;  %v101_v37 = vpack.c.bf16 %v89_v35, %v86_v34  ;;  %v60_v38 = vld [vmem:[%s471_s0] sm:$0xff]  ;;  %v61_v39 = vld [vmem:[%s471_s0 + $0x8] sm:$0xff]  ;;  %v62_v41 = vld [vmem:[%s471_s0 + $0x10] sm:$0xff] }
  0x1c   :  { %316 = vmatprep.subr.bf16.mxu1 %v365_v0  ;;  %118 = vmatprep.subr.bf16.mxu0 %v99_v23  ;;  %v65_v40 = vpack.c.bf16 %v61_v39, %v60_v38  ;;  %v63_v42 = vld [vmem:[%s471_s0 + $0x18] sm:$0xff]  ;;  %v64_v44 = vld [vmem:[%s471_s0 + $0x20] sm:$0x3]  ;;  %v59_v62 = vld [vmem:[#allocation2 + $0x70] sm:$0x3] }
  0x1d   :  { %v66_v43 = vpack.c.bf16 %v63_v42, %v62_v41  ;;  %v67_v45 = vpack.c.bf16 %v64_v44, %v64_v44  ;;  %v57_v63 = vld [vmem:[#allocation2 + $0x60] sm:$0x3] }
  0x1f   :  { %317 = vmatpush3.bf16.msra.mxu1 %v100_v29  ;;  %119 = vmatpush1.bf16.msra.mxu0 %v98_v30 }
  0x20   :  { %318 = vmatprep.subr.bf16.mxu1 %v365_v0  ;;  %120 = vmatprep.subr.bf16.mxu0 %v102_v32 }
  0x23   :  { %319 = vmatpush3.bf16.msra.mxu1 %v103_v36  ;;  %121 = vmatpush1.bf16.msra.mxu0 %v101_v37 }
  0x26   :  { %321 = vmatmul.mubr.msk.bf16.vlgmr.msra.gmra.mrb[0].mxu1 %vm104_vm1, %v65_v40  ;;  %299 = vmatmul.mubr.msk.bf16.vlgmr.msra.gmra.mrb[0].mxu0 %vm104_vm1, %v65_v40 }
  0x27   :  { %324 = vmatprep.mubr.msk.bf16.mxu1 %vm366_vm0, %v365_v0  ;;  %156 = vmatprep.mubr.bf16.mxu0 %v367_v1 }
  0x2e   :  { %325 = vmatmul.mubr.msk.bf16.gmra.mrb[4].mxu1 %vm104_vm1, %v66_v43  ;;  %300 = vmatmul.mubr.msk.bf16.gmra.mrb[4].mxu0 %vm104_vm1, %v66_v43 }
  0x2f   :  { %328 = vmatprep.mubr.msk.bf16.mxu1 %vm366_vm0, %v365_v0  ;;  %166 = vmatprep.mubr.bf16.mxu0 %v367_v1  ;;  %v58_v0 = vld [vmem:[#allocation2 + $0x68] sm:$0x3] }
  0x36   :  { %329 = vmatmul.mubr.msk.bf16.gmra.mrb[8].mxu1 %vm104_vm1, %v67_v45  ;;  %301 = vmatmul.mubr.msk.bf16.gmra.mrb[8].mxu0 %vm104_vm1, %v67_v45 }
  0xf9   :  { %v209_v46 = vpop.f32.mrb[0].mxu1  ;;  %v148_v47 = vpop.f32.mrb[0].mxu0 }
  0xfa   :  { %v322_v48 = vpop.f32.mrb[1].mxu1  ;;  %v150_v49 = vpop.f32.mrb[1].mxu0  ;;  %281 = vst [vmem:[%s473_s2 + $0x10] sm:$0xff] %v209_v46  ;;  %279 = vst [vmem:[%s473_s2] sm:$0xff] %v148_v47 }
  0xfb   :  { %v212_v50 = vpop.f32.mrb[2].mxu1  ;;  %v152_v51 = vpop.f32.mrb[2].mxu0  ;;  %280 = vst [vmem:[%s473_s2 + $0x8] sm:$0xff] %v150_v49 }
  0xfc   :  { %v323_v52 = vpop.f32.mrb[3].mxu1  ;;  %v154_v53 = vpop.f32.mrb[3].mxu0  ;;  %284 = vst [vmem:[%s473_s2 + $0x28] sm:$0xff] %v212_v50  ;;  %282 = vst [vmem:[%s473_s2 + $0x18] sm:$0xff] %v152_v51 }
  0xfd   :  { %283 = vst [vmem:[%s473_s2 + $0x20] sm:$0xff] %v154_v53 }
 0x101   :  { %v217_v54 = vpop.f32.mrb[4].mxu1  ;;  %v158_v55 = vpop.f32.mrb[4].mxu0 }
 0x102   :  { %v326_v56 = vpop.f32.mrb[5].mxu1  ;;  %v160_v57 = vpop.f32.mrb[5].mxu0  ;;  %287 = vst [vmem:[%s473_s2 + $0x40] sm:$0xff] %v217_v54  ;;  %285 = vst [vmem:[%s473_s2 + $0x30] sm:$0xff] %v158_v55 }
 0x103   :  { %v220_v58 = vpop.f32.mrb[6].mxu1  ;;  %v162_v59 = vpop.f32.mrb[6].mxu0  ;;  %286 = vst [vmem:[%s473_s2 + $0x38] sm:$0xff] %v160_v57 }
 0x104   :  { %v327_v60 = vpop.f32.mrb[7].mxu1  ;;  %v164_v61 = vpop.f32.mrb[7].mxu0  ;;  %290 = vst [vmem:[%s473_s2 + $0x58] sm:$0xff] %v220_v58  ;;  %288 = vst [vmem:[%s473_s2 + $0x48] sm:$0xff] %v162_v59 }
 0x105   :  { %289 = vst [vmem:[%s473_s2 + $0x50] sm:$0xff] %v164_v61 }
 0x109   :  { %v225_v1 = vpop.f32.mrb[8].mxu1  ;;  %v168_v2 = vpop.f32.mrb[8].mxu0 }
 0x10a   :  { %v245_v3 = vadd.f32 %v225_v1, %v59_v62  ;;  %v243_v4 = vadd.f32 %v168_v2, %v57_v63  ;;  %v330_v5 = vpop.f32.mrb[9].mxu1  ;;  %v170_v6 = vpop.f32.mrb[9].mxu0 }
 0x10b   :  { %v244_v7 = vadd.f32 %v170_v6, %v58_v0  ;;  %v228_v8 = vpop.f32.mrb[10].mxu1  ;;  %v172_v9 = vpop.f32.mrb[10].mxu0 }
 0x10c   :  { %260 = vst [vmem:[#allocation2 + $0x70] sm:$0x3] %v245_v3  ;;  %258 = vst [vmem:[#allocation2 + $0x60] sm:$0x3] %v243_v4  ;;  %v331_v10 = vpop.f32.mrb[11].mxu1  ;;  %v173_v11 = vpop.f32.mrb[11].mxu0 }
 0x10d   :  { %259 = vst [vmem:[#allocation2 + $0x68] sm:$0x3] %v244_v7 }
 0x113   :  { %v278_v12 = vld [vmem:[#allocation2 + $0x70] sm:$0x3]  ;;  %v276_v13 = vld [vmem:[#allocation2 + $0x60] sm:$0x3] }
 0x114   :  { %293 = vst [vmem:[%s473_s2 + $0x70] sm:$0x3] %v278_v12  ;;  %291 = vst [vmem:[%s473_s2 + $0x60] sm:$0x3] %v276_v13  ;;  %v277_v14 = vld [vmem:[#allocation2 + $0x68] sm:$0x3] }
 0x115   :  { %292 = vst [vmem:[%s473_s2 + $0x68] sm:$0x3] %v277_v14 }
 0x116   :  { %298 = vsyncpa [#allocation4], 1 }

// kernel: attention_forward.4
= control target key start
LH: loop header
LB: loop body
LE: loop exit
PB: predicated region body
PF: predicated region fallthrough
CT: control target
= control target key end

     0   :  { %s2272_s6 = smov 0   ;;  %s2968_s0 = inlined_call_operand.vmem [shape: f32[2,17,384], index: 0, kind: input, shape index: {}]   ;;  %s2969_s1 = inlined_call_operand.vmem [shape: f32[2,17,128], index: 1, kind: output, shape index: {}]  }
   0x1 LB: > { %s1985_s7 = sadd.s32 4294967295, %s2254_s6   ;;  %p1989_p0 = scmp.ge.s32.totalorder %s2254_s6, 1  ;;  %s2254_s6 = sphi %s2272_s6, %s11_s6  }
   0x2   : > { %p87_p1 = scmp.lt.s32.totalorder %s2254_s6, 3 }
   0x4   : > { %p88_p2 = pnand %p1989_p0, %p87_p1 }
   0x5   : > { %p107_p3 = scmp.lt.s32.totalorder (!%p88_p2), %s1985_s7, 1  ;;  %v2256_v0 = vmov (!%p88_p2), 0.0   ;;  %vm2257_vm0 = vmmov (!%p88_p2), 0   ;;  %vm545_vm1 = vcmask (!%p88_p2), 1046528   ;;  %s2258_s12 = smov (!%p88_p2), 96   ;;  %vm245_vm2 = vcmask (!%p88_p2), 261120  }
   0x6   : > { %91 = sbr.rel (%p88_p2) target bundleno = 1131 (0x46b), region = 24  ;;  %2042 = vmatprep.subr.bf16.mxu0 (!%p88_p2), %v2256_v0  ;;  %2048 = vmatprep.subr.bf16.mxu1 (!%p88_p2), %v2256_v0  ;;  %s2259_s13 = smov (!%p88_p2), 64   ;;  %v217_v23 = vlaneseq (!%p88_p2)  ;;  %vm496_vm3 = vcmask (!%p88_p2), 261121   ;;  %vm252_vm4 = vcmask (!%p88_p2), 253952   ;;  %vm1030_vm5 = vcmask (!%p88_p2), 64512  }
   0x7   : > { %2044 = vmatprep.mubr.msk.bf16.mxu0 (!%p88_p2), %vm2257_vm0, %v2256_v0  ;;  %2050 = vmatprep.mubr.msk.bf16.mxu1 (!%p88_p2), %vm2257_vm0, %v2256_v0  ;;  %s2260_s14 = smov (!%p88_p2), 32   ;;  %vm296_vm6 = vcmask (!%p88_p2), 1040384   ;;  %vm1318_vm7 = vcmask (!%p88_p2), 1043456   ;;  %vm1923_vm8 = vcmask (!%p88_p2), 785408   ;;  %vm1919_vm9 = vcmask (!%p88_p2), 523264  }
   0x8   : > { %v218_v24 = vshrl.u32 (!%p88_p2), %v217_v23, 7 }
   0xa   : > { %v2350_v25 = vsub.s32 (!%p88_p2), 0, %v218_v24 }
   0xd   : > { %s2977_s7 = smov (!%p107_p3, %s1985_s7), 1 }
   0xe   : > { %s2138_s8 = smul.u32 72, %s2977_s7 }
   0xf   : > { %s2139_s15 = smul.u32 24, %s2977_s7 }
  0x10   : > { %s2292_s11 = scalar_lea.vmem %s2968_s0, %s2138_s8 }
  0x11   : > { %v125_v1 = vld [vmem:[%s2292_s11 + $0x38] sm:$0x1]  ;;  %v2296_v2 = vld [vmem:[%s2292_s11 + $0x8] sm:$0xff]  ;;  %v2299_v3 = vld [vmem:[%s2292_s11 + $0x20] sm:$0xff]  ;;  %s116_s18 = scalar_lea.vmem %s2969_s1, %s2139_s15 }
  0x12   : > { %164 = vrot.lane.b32.xlu1 %v125_v1, %s2258_s12  ;;  %160 = vrot.lane.b32.xlu0 %v2296_v2, %s2258_s12  ;;  %v582_v4 = vrot.slane %v2296_v2, 1  ;;  %v583_v5 = vrot.slane %v2299_v3, 1  ;;  %v585_v6 = vrot.slane %v125_v1, 1  ;;  %v121_v7 = vld [vmem:[%s2292_s11 + $0x18] sm:$0xff]  ;;  %v2308_v8 = vld [vmem:[%s2292_s11] sm:$0xff]  ;;  %v471_v26 = vrot.slane %v2296_v2, %v2350_v25 }
  0x13   : > { %v547_v9 = vrot.slane %v121_v7, 1  ;;  %v124_v10 = vld [vmem:[%s2292_s11 + $0x30] sm:$0x1]  ;;  %v546_v14 = vrot.slane %v2308_v8, 1 }
  0x14   : > { %v584_v11 = vsel %vm545_vm1, %v582_v4, %v583_v5  ;;  %v586_v12 = vsel %vm545_vm1, %v583_v5, %v585_v6  ;;  %v549_v13 = vrot.slane %v124_v10, 1  ;;  %v484_v27 = vmul.f32 %v471_v26, %v2308_v8 }
  0x15   : > { %v610_v15 = vpack.c.bf16 %v584_v11, %v584_v11  ;;  %v611_v16 = vpack.c.bf16 %v586_v12, %v586_v12  ;;  %v548_v19 = vsel %vm545_vm1, %v546_v14, %v547_v9  ;;  %v486_v29 = vmul.f32 %v471_v26, %v124_v10 }
  0x16   : > { %162 = vrot.lane.b32.xlu0 %v2299_v3, %s2258_s12  ;;  %130 = vrot.lane.b32.xlu1 %v2308_v8, %s2258_s12  ;;  %v550_v20 = vsel %vm545_vm1, %v547_v9, %v549_v13  ;;  %v574_v21 = vpack.c.bf16 %v548_v19, %v548_v19  ;;  %v497_v28 = vsel %vm496_vm3, %v484_v27, 0.0  ;;  %v485_v30 = vmul.f32 %v471_v26, %v121_v7 }
  0x17   : > { %v658_v17 = vsel %vm245_vm2, %v610_v15, 0  ;;  %v704_v18 = vsel %vm245_vm2, %v611_v16, 0  ;;  %v575_v22 = vpack.c.bf16 %v550_v20, %v550_v20  ;;  %v503_v31 = vsel %vm252_vm4, %v486_v29, 0.0 }
  0x18   : > { %2043 = vmatpush3.bf16.xpose.msra.mxu0 %v658_v17  ;;  %2049 = vmatpush3.bf16.xpose.msra.mxu1 %v704_v18  ;;  %v500_v32 = vsel %vm245_vm2, %v485_v30, 0.0 }
  0x19   : > { %2054 = vmatprep.subr.bf16.mxu0 %v2256_v0  ;;  %2060 = vmatprep.subr.bf16.mxu1 %v2256_v0 }
  0x1a   : > { %132 = vrot.lane.b32.xlu0 %v121_v7, %s2258_s12  ;;  %134 = vrot.lane.b32.xlu1 %v124_v10, %s2258_s12 }
  0x1e   : > { %169 = vrot.lane.b32.xlu0 %v2296_v2, %s2259_s13  ;;  %171 = vrot.lane.b32.xlu1 %v2299_v3, %s2259_s13 }
  0x1f   : > { %2045 = vmatmul.mubr.msk.bf16.vlgmr.msra.gmra.mrb[0].mxu0 %vm245_vm2, %v574_v21  ;;  %2051 = vmatmul.mubr.msk.bf16.vlgmr.msra.gmra.mrb[0].mxu1 %vm245_vm2, %v575_v22 }
  0x20   : > { %2056 = vmatprep.mubr.msk.bf16.mxu0 %vm2257_vm0, %v2256_v0  ;;  %2062 = vmatprep.mubr.msk.bf16.mxu1 %vm2257_vm0, %v2256_v0 }
  0x22   : > { %173 = vrot.lane.b32.xlu0 %v125_v1, %s2259_s13  ;;  %139 = vrot.lane.b32.xlu1 %v2308_v8, %s2259_s13 }
  0x26   : > { %141 = vrot.lane.b32.xlu0 %v121_v7, %s2259_s13  ;;  %143 = vrot.lane.b32.xlu1 %v124_v10, %s2259_s13 }
  0x2a   : > { %178 = vrot.lane.b32.xlu0 %v2296_v2, %s2260_s14  ;;  %180 = vrot.lane.b32.xlu1 %v2299_v3, %s2260_s14 }
  0x2e   : > { %182 = vrot.lane.b32.xlu0 %v125_v1, %s2260_s14  ;;  %148 = vrot.lane.b32.xlu1 %v2308_v8, %s2260_s14 }
  0x32   : > { %150 = vrot.lane.b32.xlu0 %v121_v7, %s2260_s14  ;;  %152 = vrot.lane.b32.xlu1 %v124_v10, %s2260_s14 }
  0x51   : > { %498 = vadd.xlane.f32.xlu0 %v497_v28 }
  0x55   : > { %504 = vadd.xlane.f32.xlu0 %v503_v31 }
  0x56   : > { %501 = vadd.xlane.f32.xlu1 %v500_v32 }
  0x84   : > { %v165_v33 = vpop.permute.xlu1 %164  ;;  %v2358_v34 = vpop.permute.xlu0 %160 }
  0x85   : > { %v475_v35 = vrot.slane %v2358_v34, %v2350_v25  ;;  %v590_v36 = vrot.slane %v165_v33, 1  ;;  %v587_v39 = vrot.slane %v2358_v34, 1 }
  0x88   : > { %v2362_v37 = vpop.permute.xlu0 %162  ;;  %v131_v38 = vpop.permute.xlu1 %130 }
  0x89   : > { %v588_v40 = vrot.slane %v2362_v37, 1  ;;  %v2367_v41 = vrot.slane %v131_v38, %v2350_v25  ;;  %v487_v42 = vmul.f32 %v475_v35, %v131_v38  ;;  %v551_v57 = vrot.slane %v131_v38, 1 }
  0x8b   : > { %v506_v43 = vsel %vm496_vm3, %v487_v42, 0.0  ;;  %v589_v44 = vsel %vm545_vm1, %v587_v39, %v588_v40  ;;  %v591_v45 = vsel %vm545_vm1, %v588_v40, %v590_v36  ;;  %v2373_v50 = vmul.f32 %v2367_v41, %v165_v33 }
  0x8c   : > { %v133_v46 = vpop.permute.xlu0 %132  ;;  %v135_v47 = vpop.permute.xlu1 %134  ;;  %507 = vadd.xlane.f32.xlu0 %v506_v43  ;;  %v612_v48 = vpack.c.bf16 %v589_v44, %v589_v44  ;;  %v613_v49 = vpack.c.bf16 %v591_v45, %v591_v45 }
  0x8d   : > { %v552_v51 = vrot.slane %v133_v46, 1  ;;  %v489_v52 = vmul.f32 %v475_v35, %v135_v47  ;;  %v554_v53 = vrot.slane %v135_v47, 1  ;;  %v488_v54 = vmul.f32 %v475_v35, %v133_v46 }
  0x8e   : > { %v750_v55 = vsel %vm245_vm2, %v612_v48, 0  ;;  %v796_v56 = vsel %vm245_vm2, %v613_v49, 0 }
  0x8f   : > { %2055 = vmatpush3.bf16.xpose.msra.mxu0 %v750_v55  ;;  %2061 = vmatpush3.bf16.xpose.msra.mxu1 %v796_v56  ;;  %v509_v58 = vsel %vm245_vm2, %v488_v54, 0.0  ;;  %v512_v59 = vsel %vm252_vm4, %v489_v52, 0.0  ;;  %v553_v62 = vsel %vm545_vm1, %v551_v57, %v552_v51  ;;  %v555_v63 = vsel %vm545_vm1, %v552_v51, %v554_v53 }
  0x90   : > { %v2379_v60 = vpop.permute.xlu0 %169  ;;  %510 = vadd.xlane.f32.xlu1 %v509_v58  ;;  %v172_v61 = vpop.permute.xlu1 %171  ;;  %513 = vadd.xlane.f32.xlu0 %v512_v59  ;;  %v576_v6 = vpack.c.bf16 %v553_v62, %v553_v62  ;;  %v577_v7 = vpack.c.bf16 %v555_v63, %v555_v63 }
  0x91   : > { %v592_v1 = vrot.slane %v2379_v60, 1  ;;  %v593_v4 = vrot.slane %v172_v61, 1  ;;  %2066 = vmatprep.subr.bf16.mxu0 %v2256_v0  ;;  %2072 = vmatprep.subr.bf16.mxu1 %v2256_v0  ;;  %v2401_v15 = vrot.slane %v2379_v60, %v2350_v25 }
  0x93   : > { %v594_v5 = vsel %vm545_vm1, %v592_v1, %v593_v4 }
  0x94   : > { %v2387_v9 = vpop.permute.xlu0 %173  ;;  %v2389_v10 = vpop.permute.xlu1 %139  ;;  %v614_v11 = vpack.c.bf16 %v594_v5, %v594_v5 }
  0x95   : > { %v595_v12 = vrot.slane %v2387_v9, 1  ;;  %v2394_v13 = vrot.slane %v2389_v10, %v2350_v25  ;;  %v556_v16 = vrot.slane %v2389_v10, 1 }
  0x96   : > { %2057 = vmatmul.mubr.msk.bf16.vlgmr.msra.gmra.mrb[4].mxu0 %vm245_vm2, %v576_v6  ;;  %2063 = vmatmul.mubr.msk.bf16.vlgmr.msra.gmra.mrb[4].mxu1 %vm245_vm2, %v577_v7  ;;  %v842_v14 = vsel %vm245_vm2, %v614_v11, 0 }
  0x97   : > { %2067 = vmatpush3.bf16.xpose.msra.mxu0 %v842_v14  ;;  %v596_v17 = vsel %vm545_vm1, %v593_v4, %v595_v12  ;;  %2068 = vmatprep.mubr.msk.bf16.mxu0 %vm2257_vm0, %v2256_v0  ;;  %v2408_v18 = vmul.f32 %v2394_v13, %v172_v61 }
  0x98   : > { %v2410_v19 = vpop.permute.xlu0 %141  ;;  %v144_v20 = vpop.permute.xlu1 %143  ;;  %v615_v21 = vpack.c.bf16 %v596_v17, %v596_v17  ;;  %2074 = vmatprep.mubr.msk.bf16.mxu1 %vm2257_vm0, %v2256_v0  ;;  %2078 = vmatprep.subr.bf16.mxu0 %v2256_v0 }
  0x99   : > { %v557_v22 = vrot.slane %v2410_v19, 1  ;;  %v2417_v23 = vmul.f32 %v2401_v15, %v144_v20  ;;  %v559_v24 = vrot.slane %v144_v20, 1 }
  0x9a   : > { %v888_v26 = vsel %vm245_vm2, %v615_v21, 0 }
  0x9b   : > { %v558_v27 = vsel %vm545_vm1, %v556_v16, %v557_v22  ;;  %2073 = vmatpush3.bf16.xpose.msra.mxu1 %v888_v26  ;;  %v560_v31 = vsel %vm545_vm1, %v557_v22, %v559_v24  ;;  %v490_v22 = vmul.f32 %v2401_v15, %v2389_v10  ;;  %v491_v24 = vmul.f32 %v2401_v15, %v2410_v19 }
  0x9c   : > { %v578_v28 = vpack.c.bf16 %v558_v27, %v558_v27  ;;  %v179_v29 = vpop.permute.xlu0 %178  ;;  %v181_v30 = vpop.permute.xlu1 %180  ;;  %2084 = vmatprep.subr.bf16.mxu1 %v2256_v0  ;;  %v579_v38 = vpack.c.bf16 %v560_v31, %v560_v31 }
  0x9d   : > { %v483_v32 = vrot.slane %v179_v29, %v2350_v25  ;;  %v597_v33 = vrot.slane %v179_v29, 1  ;;  %v598_v35 = vrot.slane %v181_v30, 1 }
  0x9e   : > { %2069 = vmatmul.mubr.msk.bf16.vlgmr.msra.gmra.mrb[8].mxu0 %vm245_vm2, %v578_v28  ;;  %v515_v28 = vsel %vm496_vm3, %v490_v22, 0.0 }
  0x9f   : > { %v599_v36 = vsel %vm545_vm1, %v597_v33, %v598_v35  ;;  %2080 = vmatprep.mubr.msk.bf16.mxu0 %vm2257_vm0, %v2256_v0 }
  0xa0   : > { %v183_v39 = vpop.permute.xlu0 %182  ;;  %v616_v40 = vpack.c.bf16 %v599_v36, %v599_v36  ;;  %v149_v42 = vpop.permute.xlu1 %148 }
  0xa1   : > { %v600_v43 = vrot.slane %v183_v39, 1  ;;  %v232_v44 = vrot.slane %v149_v42, %v2350_v25  ;;  %v2429_v45 = vmul.f32 %v483_v32, %v149_v42  ;;  %v561_v47 = vrot.slane %v149_v42, 1 }
  0xa2   : > { %2075 = vmatmul.mubr.msk.bf16.vlgmr.msra.gmra.mrb[8].mxu1 %vm245_vm2, %v579_v38  ;;  %v934_v46 = vsel %vm245_vm2, %v616_v40, 0 }
  0xa3   : > { %2079 = vmatpush3.bf16.xpose.msra.mxu0 %v934_v46  ;;  %v601_v48 = vsel %vm545_vm1, %v598_v35, %v600_v43  ;;  %2086 = vmatprep.mubr.msk.bf16.mxu1 %vm2257_vm0, %v2256_v0  ;;  %v2436_v49 = vmul.f32 %v232_v44, %v179_v29  ;;  %v2438_v51 = vmul.f32 %v232_v44, %v181_v30  ;;  %v518_v29 = vsel %vm245_vm2, %v491_v24, 0.0 }
  0xa4   : > { %v151_v52 = vpop.permute.xlu0 %150  ;;  %v617_v53 = vpack.c.bf16 %v601_v48, %v601_v48  ;;  %v153_v54 = vpop.permute.xlu1 %152  ;;  %2090 = vmatprep.subr.bf16.mxu0 %v2256_v0  ;;  %v2441_v55 = vmul.f32 %v232_v44, %v183_v39  ;;  %v2261_v30 = vmov 0   ;;  %v521_v44 = vsel %vm252_vm4, %v2417_v23, 0.0 }
  0xa5   : > { %v2443_v56 = vmul.f32 %v483_v32, %v151_v52  ;;  %v562_v57 = vrot.slane %v151_v52, 1  ;;  %v2445_v58 = vmul.f32 %v483_v32, %v153_v54  ;;  %v564_v59 = vrot.slane %v153_v54, 1  ;;  %2154 = vset.pattern.permute.xlu1 %v2261_v30  ;;  %2155 = vset.pattern.permute.xlu0 %v2261_v30 }
  0xa6   : > { %v980_v61 = vsel %vm245_vm2, %v617_v53, 0  ;;  %v524_v46 = vsel %vm496_vm3, %v2429_v45, 0.0 }
  0xa7   : > { %v563_v62 = vsel %vm545_vm1, %v561_v47, %v562_v57  ;;  %2085 = vmatpush3.bf16.xpose.msra.mxu1 %v980_v61  ;;  %v565_v63 = vsel %vm545_vm1, %v562_v57, %v564_v59 }
  0xa8   : > { %v580_v1 = vpack.c.bf16 %v563_v62, %v563_v62  ;;  %2096 = vmatprep.subr.bf16.mxu1 %v2256_v0  ;;  %v581_v4 = vpack.c.bf16 %v565_v63, %v565_v63 }
  0xaa   : > { %2081 = vmatmul.mubr.msk.bf16.vlgmr.msra.gmra.mrb[12].mxu0 %vm245_vm2, %v580_v1 }
  0xab   : > { %2092 = vmatprep.mubr.msk.bf16.mxu0 %vm2257_vm0, %v2256_v0 }
  0xae   : > { %2087 = vmatmul.mubr.msk.bf16.vlgmr.msra.gmra.mrb[12].mxu1 %vm245_vm2, %v581_v4 }
  0xaf   : > { %2098 = vmatprep.mubr.msk.bf16.mxu1 %vm2257_vm0, %v2256_v0 }
  0xde   : > { %v499_v43 = vpop.xlane.xlu0 %498 }
  0xe2   : > { %v505_v53 = vpop.xlane.xlu0 %504 }
  0xe3   : > { %v502_v1 = vpop.xlane.xlu1 %501 }
  0xf2   : > { %v694_v5 = vpop.f32.mrb[0].mxu0  ;;  %v740_v6 = vpop.f32.mrb[0].mxu1 }
  0xf3   : > { %v2457_v7 = vmul.f32 0.17677669, %v694_v5  ;;  %v2459_v11 = vmul.f32 0.17677669, %v740_v6  ;;  %v2046_v12 = vpop.f32.mrb[1].mxu0  ;;  %v2052_v14 = vpop.f32.mrb[1].mxu1 }
  0xf4   : > { %v697_v16 = vpop.f32.mrb[2].mxu0  ;;  %v743_v17 = vpop.f32.mrb[2].mxu1  ;;  %v530_v5 = vsel %vm252_vm4, %v2445_v58, 0.0  ;;  %v2493_v6 = vmul.f32 0.17677669, %v499_v43 }
  0xf5   : > { %v1034_v20 = vsel %vm1030_vm5, %v2459_v11, -inf  ;;  %v1031_v21 = vsel %vm1030_vm5, %v2457_v7, -inf  ;;  %v2047_v26 = vpop.f32.mrb[3].mxu0  ;;  %v2053_v27 = vpop.f32.mrb[3].mxu1  ;;  %v2495_v12 = vmul.f32 0.17677669, %v505_v53 }
  0xf6   : > { %1035 = vmax.xlane.f32.xlu1 %v1034_v20  ;;  %1032 = vmax.xlane.f32.xlu0 %v1031_v21  ;;  %v2497_v14 = vmul.f32 0.17677669, %v502_v1  ;;  %v527_v17 = vsel %vm245_vm2, %v2443_v56, 0.0  ;;  %v1067_v20 = vrot.slane %v2493_v6, 1  ;;  %v2529_v53 = vld [vmem:[%s2292_s11 + $0x10] sm:$0xff] }
  0xf7   : > { %v1070_v21 = vrot.slane %v2495_v12, 1  ;;  %v2544_v1 = vld [vmem:[%s2292_s11 + $0x40] sm:$0x1] }
  0xf8   : > { %v1068_v22 = vrot.slane %v2497_v14, 1 }
  0xfa   : > { %516 = vadd.xlane.f32.xlu1 %v515_v28  ;;  %519 = vadd.xlane.f32.xlu0 %v518_v29  ;;  %v1071_v56 = vsel %vm545_vm1, %v1068_v22, %v1070_v21 }
 0x119   : > { %v508_v16 = vpop.xlane.xlu0 %507 }
 0x11d   : > { %v511_v24 = vpop.xlane.xlu1 %510  ;;  %v514_v28 = vpop.xlane.xlu0 %513 }
 0x11e   : > { %v2553_v21 = vmul.f32 0.17677669, %v514_v28 }
 0x169   : > { %v786_v31 = vpop.f32.mrb[4].mxu0  ;;  %v832_v32 = vpop.f32.mrb[4].mxu1 }
 0x16a   : > { %v2471_v33 = vmul.f32 0.17677669, %v786_v31  ;;  %v2473_v10 = vmul.f32 0.17677669, %v832_v32  ;;  %v2058_v15 = vpop.f32.mrb[5].mxu0  ;;  %v2064_v19 = vpop.f32.mrb[5].mxu1 }
 0x16b   : > { %v789_v35 = vpop.f32.mrb[6].mxu0  ;;  %v835_v36 = vpop.f32.mrb[6].mxu1  ;;  %v1069_v15 = vsel %vm545_vm1, %v1067_v20, %v1068_v22  ;;  %v2551_v20 = vmul.f32 0.17677669, %v511_v24  ;;  %v2555_v22 = vmul.f32 0.17677669, %v508_v16 }
 0x16c   : > { %v2059_v38 = vpop.f32.mrb[7].mxu0  ;;  %v2065_v39 = vpop.f32.mrb[7].mxu1  ;;  %v1037_v40 = vsel %vm1030_vm5, %v2471_v33, -inf  ;;  %v1040_v42 = vsel %vm1030_vm5, %v2473_v10, -inf }
 0x16d   : > { %1038 = vmax.xlane.f32.xlu1 %v1037_v40  ;;  %1041 = vmax.xlane.f32.xlu0 %v1040_v42 }
 0x171   : > { %522 = vadd.xlane.f32.xlu1 %v521_v44  ;;  %v878_v47 = vpop.f32.mrb[8].mxu0  ;;  %525 = vadd.xlane.f32.xlu0 %v524_v46 }
 0x172   : > { %v2483_v48 = vmul.f32 0.17677669, %v878_v47  ;;  %v2070_v52 = vpop.f32.mrb[9].mxu0 }
 0x173   : > { %v881_v54 = vpop.f32.mrb[10].mxu0 }
 0x174   : > { %v2071_v57 = vpop.f32.mrb[11].mxu0  ;;  %v1043_v59 = vsel %vm1030_vm5, %v2483_v48, -inf  ;;  %v2534_v54 = vld [vmem:[%s2292_s11 + $0x28] sm:$0xff] }
 0x175   : > { %v924_v61 = vpop.f32.mrb[8].mxu1  ;;  %1044 = vmax.xlane.f32.xlu0 %v1043_v59  ;;  %v618_v57 = vrot.slane %v2529_v53, 1  ;;  %v619_v59 = vrot.slane %v2534_v54, 1 }
 0x176   : > { %v2487_v62 = vmul.f32 0.17677669, %v924_v61  ;;  %v2076_v23 = vpop.f32.mrb[9].mxu1 }
 0x177   : > { %v927_v63 = vpop.f32.mrb[10].mxu1  ;;  %v620_v61 = vsel %vm545_vm1, %v618_v57, %v619_v59 }
 0x178   : > { %v2077_v45 = vpop.f32.mrb[11].mxu1  ;;  %v1046_v4 = vsel %vm1030_vm5, %v2487_v62, -inf  ;;  %v646_v23 = vpack.c.bf16 %v620_v61, %v620_v61 }
 0x179   : > { %1047 = vmax.xlane.f32.xlu1 %v1046_v4  ;;  %531 = vadd.xlane.f32.xlu0 %v530_v5  ;;  %v621_v45 = vrot.slane %v2544_v1, 1 }
 0x17a   : > { %v1320_v63 = vsel %vm1318_vm7, %v646_v23, 0 }
 0x17b   : > { %2091 = vmatpush3.bf16.msra.mxu0 %v1320_v63  ;;  %v622_v4 = vsel %vm545_vm1, %v619_v59, %v621_v45 }
 0x17c   : > { %2102 = vmatprep.subr.bf16.mxu0 %v2256_v0  ;;  %v647_v5 = vpack.c.bf16 %v622_v4, %v622_v4 }
 0x17d   : > { %528 = vadd.xlane.f32.xlu1 %v527_v17  ;;  %v970_v58 = vpop.f32.mrb[12].mxu0 }
 0x17e   : > { %v2504_v26 = vmul.f32 0.17677669, %v970_v58  ;;  %v2082_v27 = vpop.f32.mrb[13].mxu0  ;;  %v1366_v17 = vsel %vm1318_vm7, %v647_v5, 0  ;;  %v1073_v58 = vrot.slane %v2551_v20, 1 }
 0x17f   : > { %v973_v29 = vpop.f32.mrb[14].mxu0  ;;  %2097 = vmatpush3.bf16.msra.mxu1 %v1366_v17  ;;  %v1075_v27 = vrot.slane %v2553_v21, 1 }
 0x180   : > { %v1049_v30 = vsel %vm1030_vm5, %v2504_v26, -inf  ;;  %v2083_v31 = vpop.f32.mrb[15].mxu0  ;;  %2108 = vmatprep.subr.bf16.mxu1 %v2256_v0 }
 0x181   : > { %v1016_v32 = vpop.f32.mrb[12].mxu1  ;;  %1050 = vmax.xlane.f32.xlu1 %v1049_v30  ;;  %v1072_v31 = vrot.slane %v2555_v22, 1  ;;  %v1076_v28 = vsel %vm545_vm1, %v1073_v58, %v1075_v27 }
 0x182   : > { %v2510_v19 = vmul.f32 0.17677669, %v1016_v32  ;;  %v2088_v35 = vpop.f32.mrb[13].mxu1 }
 0x183   : > { %v1036_v36 = vpop.xlane.xlu1 %1035  ;;  %v1033_v38 = vpop.xlane.xlu0 %1032  ;;  %v1074_v24 = vsel %vm545_vm1, %v1072_v31, %v1073_v58 }
 0x184   : > { %v2512_v39 = vmax.f32 %v1036_v36, %v1071_v56  ;;  %v2514_v40 = vmax.f32 %v1033_v38, %v1069_v15  ;;  %v1052_v42 = vsel %vm1030_vm5, %v2510_v19, -inf  ;;  %v1019_v43 = vpop.f32.mrb[14].mxu1 }
 0x185   : > { %1053 = vmax.xlane.f32.xlu0 %v1052_v42  ;;  %v2089_v44 = vpop.f32.mrb[15].mxu1 }
 0x186   : > { %v2971_v46 = vrot.slane %v2512_v39, 7  ;;  %v2970_v47 = vrot.slane %v2514_v40, 7 }
 0x187   : > { %v517_v29 = vpop.xlane.xlu1 %516  ;;  %v520_v30 = vpop.xlane.xlu0 %519 }
 0x188   : > { %v2525_v52 = vsel %vm296_vm6, %v2970_v47, %v2971_v46  ;;  %v2560_v32 = vmul.f32 0.17677669, %v517_v29  ;;  %v2562_v56 = vmul.f32 0.17677669, %v520_v30 }
 0x18a   : > { %v1077_v43 = vrot.slane %v2560_v32, 1  ;;  %v1078_v44 = vrot.slane %v2562_v56, 1 }
 0x18c   : > { %v1079_v45 = vsel %vm545_vm1, %v1077_v43, %v1078_v44 }
 0x192   : > { %1105 = vperm.xlu1 %2154, %v2514_v40  }
 0x196   : > { %190 = vrot.lane.b32.xlu1 %v2529_v53, %s2258_s12 }
 0x19a   : > { %192 = vrot.lane.b32.xlu1 %v2534_v54, %s2258_s12 }
 0x19b   : > { %1110 = vperm.xlu0 %2155, %v2512_v39  }
 0x1fa   : > { %v1039_v15 = vpop.xlane.xlu1 %1038  ;;  %v1042_v35 = vpop.xlane.xlu0 %1041 }
 0x1fb   : > { %v2566_v16 = vmax.f32 %v1039_v15, %v1074_v24  ;;  %v2568_v36 = vmax.f32 %v1042_v35, %v1076_v28 }
 0x1fd   : > { %v1170_v38 = vrot.slane %v2566_v16, 7  ;;  %v2972_v42 = vrot.slane %v2568_v36, 7  ;;  %1115 = vperm.xlu1 %2154, %v2566_v16  }
 0x1fe   : > { %v523_v57 = vpop.xlane.xlu1 %522  ;;  %v526_v59 = vpop.xlane.xlu0 %525 }
 0x1ff   : > { %v2580_v61 = vsel %vm296_vm6, %v1170_v38, %v2972_v42  ;;  %v541_v23 = vmul.f32 0.17677669, %v523_v57  ;;  %v542_v29 = vmul.f32 0.17677669, %v526_v59 }
 0x201   : > { %1120 = vperm.xlu1 %2154, %v2568_v36   ;;  %v1080_v63 = vrot.slane %v541_v23, 1 }
 0x202   : > { %v1045_v4 = vpop.xlane.xlu0 %1044 }
 0x203   : > { %v2584_v5 = vmax.f32 %v1045_v4, %v1079_v45  ;;  %v1081_v58 = vsel %vm545_vm1, %v1078_v44, %v1080_v63  ;;  %v1082_v45 = vrot.slane %v542_v29, 1 }
 0x205   : > { %1125 = vperm.xlu1 %2154, %v2584_v5   ;;  %v1173_v30 = vrot.slane %v2584_v5, 7 }
 0x206   : > { %v1048_v17 = vpop.xlane.xlu1 %1047  ;;  %v532_v15 = vpop.xlane.xlu0 %531 }
 0x207   : > { %v1100_v27 = vmax.f32 %v1048_v17, %v1081_v58  ;;  %v544_v57 = vmul.f32 0.17677669, %v532_v15 }
 0x209   : > { %v1174_v31 = vrot.slane %v1100_v27, 7  ;;  %1130 = vperm.xlu1 %2154, %v1100_v27   ;;  %v1085_v4 = vrot.slane %v544_v57, 1 }
 0x20a   : > { %v529_v24 = vpop.xlane.xlu1 %528 }
 0x20b   : > { %v2592_v28 = vsel %vm296_vm6, %v1173_v30, %v1174_v31  ;;  %v2594_v35 = vsub.f32 %v541_v23, %v1174_v31  ;;  %v2596_v43 = vmul.f32 0.17677669, %v529_v24 }
 0x20d   : > { %v1083_v44 = vrot.slane %v2596_v43, 1  ;;  %194 = vrot.lane.b32.xlu1 %v2544_v1, %s2258_s12 }
 0x20e   : > { %v1051_v59 = vpop.xlane.xlu1 %1050 }
 0x20f   : > { %v1084_v63 = vsel %vm545_vm1, %v1082_v45, %v1083_v44  ;;  %v1086_v23 = vsel %vm545_vm1, %v1083_v44, %v1085_v4 }
 0x210   : > { %v1101_v17 = vmax.f32 %v1051_v59, %v1084_v63 }
 0x212   : > { %v1176_v58 = vrot.slane %v1101_v17, 7  ;;  %v1106_v27 = vpop.permute.xlu1 %1105  ;;  %1135 = vperm.xlu1 %2154, %v1101_v17   ;;  %v1054_v31 = vpop.xlane.xlu0 %1053 }
 0x213   : > { %v1143_v24 = vsub.f32 %v2457_v7, %v1106_v27  ;;  %v1102_v15 = vmax.f32 %v1054_v31, %v1086_v23  ;;  %v237_v31 = vmul.f32 %v2367_v41, %v2362_v37  ;;  %v268_v37 = vsel %vm245_vm2, %v2408_v18, 0.0 }
 0x214   : > { %v2604_v47 = vsub.f32 %v542_v29, %v1176_v58 }
 0x215   : > { %v1151_v46 = vmul.f32 1.442695, %v1143_v24  ;;  %v1177_v42 = vrot.slane %v1102_v15, 7  ;;  %1140 = vperm.xlu0 %2155, %v1102_v15   ;;  %v259_v15 = vsel %vm245_vm2, %v237_v31, 0.0 }
 0x216   : > { %199 = vrot.lane.b32.xlu1 %v2529_v53, %s2259_s13  ;;  %v2608_v45 = vpop.permute.xlu1 %190 }
 0x217   : > { %2156 = vpow2.f32 %v1151_v46  ;;  %v2611_v59 = vsel %vm296_vm6, %v1176_v58, %v1177_v42  ;;  %v2613_v63 = vsub.f32 %v544_v57, %v1177_v42  ;;  %v623_v29 = vrot.slane %v2608_v45, 1 }
 0x218   : > { %v1201_v7 = vsub.f32 %v2596_v43, %v2611_v59 }
 0x219   : > { %201 = vrot.lane.b32.xlu0 %v2534_v54, %s2259_s13  ;;  %v1225_v5 = vmul.f32 1.442695, %v2613_v63 }
 0x21a   : > { %203 = vrot.lane.b32.xlu1 %v2544_v1, %s2259_s13  ;;  %v1111_v44 = vpop.permute.xlu0 %1110  ;;  %v2622_v4 = vpop.permute.xlu1 %192 }
 0x21b   : > { %v1144_v46 = vsub.f32 %v2459_v11, %v1111_v44  ;;  %v624_v17 = vrot.slane %v2622_v4, 1  ;;  %v262_v44 = vsel %vm252_vm4, %v2373_v50, 0.0  ;;  %v277_v50 = vsel %vm245_vm2, %v2438_v51, 0.0 }
 0x21d   : > { %v1153_v42 = vmul.f32 1.442695, %v1144_v46  ;;  %208 = vrot.lane.b32.xlu0 %v2529_v53, %s2260_s14  ;;  %v625_v57 = vsel %vm545_vm1, %v623_v29, %v624_v17  ;;  %v239_v29 = vmul.f32 %v2394_v13, %v2379_v60  ;;  %v274_v60 = vsel %vm245_vm2, %v2436_v49, 0.0 }
 0x21e   : > { %210 = vrot.lane.b32.xlu1 %v2534_v54, %s2260_s14  ;;  %v648_v58 = vpack.c.bf16 %v625_v57, %v625_v57 }
 0x21f   : > { %2158 = vpow2.f32 %v1153_v42  ;;  %v265_v46 = vsel %vm245_vm2, %v239_v29, 0.0 }
 0x220   : > { %v1412_v23 = vsel %vm1318_vm7, %v648_v58, 0 }
 0x221   : > { %v2633_v27 = vpop.eup %2156  ;;  %212 = vrot.lane.b32.xlu0 %v2544_v1, %s2260_s14  ;;  %v236_v1 = vmul.f32 %v2367_v41, %v2358_v34  ;;  %v241_v34 = vmul.f32 %v2394_v13, %v2387_v9 }
 0x222   : > { %v1307_v11 = vpack.c.bf16 %v2633_v27, %v2633_v27 }
 0x223   : > { %v256_v24 = vsel %vm245_vm2, %v236_v1, 0.0  ;;  %v271_v41 = vsel %vm252_vm4, %v241_v34, 0.0 }
 0x224   : > { %2093 = vmatmul.mubr.msk.bf16.vlgmr.msra.gmra.mrb[16].mxu0 %vm1030_vm5, %v1307_v11 }
 0x225   : > { %2103 = vmatpush3.bf16.msra.mxu0 %v1412_v23  ;;  %2104 = vmatprep.mubr.msk.bf16.mxu0 %vm2257_vm0, %v2256_v0 }
 0x226   : > { %2114 = vmatprep.subr.bf16.mxu0 %v2256_v0 }
 0x229   : > { %v2644_v53 = vpop.eup %2158 }
 0x22a   : > { %v1308_v54 = vpack.c.bf16 %v2644_v53, %v2644_v53 }
 0x22c   : > { %2099 = vmatmul.mubr.msk.bf16.vlgmr.msra.gmra.mrb[16].mxu1 %vm1030_vm5, %v1308_v54 }
 0x22d   : > { %2110 = vmatprep.mubr.msk.bf16.mxu1 %vm2257_vm0, %v2256_v0 }
 0x240   : > { %257 = vadd.xlane.f32.xlu0 %v256_v24 }
 0x242   : > { %260 = vadd.xlane.f32.xlu1 %v259_v15 }
 0x244   : > { %263 = vadd.xlane.f32.xlu0 %v262_v44 }
 0x246   : > { %266 = vadd.xlane.f32.xlu1 %v265_v46 }
 0x248   : > { %269 = vadd.xlane.f32.xlu0 %v268_v37 }
 0x24a   : > { %272 = vadd.xlane.f32.xlu1 %v271_v41 }
 0x24c   : > { %275 = vadd.xlane.f32.xlu0 %v274_v60 }
 0x24e   : > { %278 = vadd.xlane.f32.xlu1 %v277_v50 }
 0x27c   : > { %v1116_v42 = vpop.permute.xlu1 %1115 }
 0x27d   : > { %v1145_v57 = vsub.f32 %v2471_v33, %v1116_v42 }
 0x27f   : > { %v1155_v9 = vmul.f32 1.442695, %v1145_v57 }
 0x280   : > { %v1121_v13 = vpop.permute.xlu1 %1120 }
 0x281   : > { %2160 = vpow2.f32 %v1155_v9  ;;  %v1146_v18 = vsub.f32 %v2473_v10, %v1121_v13 }
 0x283   : > { %v1157_v58 = vmul.f32 1.442695, %v1146_v18 }
 0x284   : > { %v1126_v11 = vpop.permute.xlu1 %1125 }
 0x285   : > { %2162 = vpow2.f32 %v1157_v58  ;;  %v1147_v23 = vsub.f32 %v2483_v48, %v1126_v11 }
 0x287   : > { %v1159_v54 = vmul.f32 1.442695, %v1147_v23 }
 0x288   : > { %v1131_v49 = vpop.permute.xlu1 %1130 }
 0x289   : > { %2164 = vpow2.f32 %v1159_v54  ;;  %v1148_v1 = vsub.f32 %v2487_v62, %v1131_v49 }
 0x28b   : > { %v2161_v51 = vpop.eup %2160  ;;  %v1161_v31 = vmul.f32 1.442695, %v1148_v1 }
 0x28c   : > { %v2675_v24 = vpop.permute.xlu1 %194  ;;  %v1233_v33 = vsel %vm1030_vm5, %v2161_v51, 0.0  ;;  %v1309_v15 = vpack.c.bf16 %v2161_v51, %v2161_v51  ;;  %v1227_v51 = vsel %vm1030_vm5, %v2633_v27, 0.0  ;;  %v1194_v27 = vsub.f32 %v2555_v22, %v1170_v38 }
 0x28d   : > { %2166 = vpow2.f32 %v1161_v31  ;;  %v626_v10 = vrot.slane %v2675_v24, 1  ;;  %1234 = vadd.xlane.f32.xlu1 %v1233_v33 }
 0x28e   : > { %2105 = vmatmul.mubr.msk.bf16.vlgmr.msra.gmra.mrb[20].mxu0 %vm1030_vm5, %v1309_v15  ;;  %v1209_v22 = vmul.f32 1.442695, %v1194_v27 }
 0x28f   : > { %v2163_v29 = vpop.eup %2162  ;;  %v627_v48 = vsel %vm545_vm1, %v624_v17, %v626_v10  ;;  %2116 = vmatprep.mubr.msk.bf16.mxu0 %vm2257_vm0, %v2256_v0 }
 0x290   : > { %v1236_v62 = vsel %vm1030_vm5, %v2163_v29, 0.0  ;;  %v649_v44 = vpack.c.bf16 %v627_v48, %v627_v48  ;;  %v1310_v57 = vpack.c.bf16 %v2163_v29, %v2163_v29 }
 0x291   : > { %v1136_v46 = vpop.permute.xlu1 %1135  ;;  %1237 = vadd.xlane.f32.xlu0 %v1236_v62 }
 0x292   : > { %v1149_v34 = vsub.f32 %v2504_v26, %v1136_v46  ;;  %v1458_v37 = vsel %vm1318_vm7, %v649_v44, 0  ;;  %v2696_v26 = vrot.slane %v2308_v8, %v2350_v25 }
 0x293   : > { %v2165_v41 = vpop.eup %2164  ;;  %2109 = vmatpush3.bf16.msra.mxu1 %v1458_v37 }
 0x294   : > { %v1163_v60 = vmul.f32 1.442695, %v1149_v34  ;;  %v1141_v50 = vpop.permute.xlu0 %1140  ;;  %v1239_v42 = vsel %vm1030_vm5, %v2165_v41, 0.0  ;;  %2120 = vmatprep.subr.bf16.mxu1 %v2256_v0  ;;  %v233_v8 = vmul.f32 %v2696_v26, %v2296_v2 }
 0x295   : > { %v1150_v17 = vsub.f32 %v2510_v19, %v1141_v50  ;;  %v2691_v9 = vpop.permute.xlu1 %199  ;;  %1240 = vadd.xlane.f32.xlu0 %v1239_v42 }
 0x296   : > { %2168 = vpow2.f32 %v1163_v60  ;;  %2111 = vmatmul.mubr.msk.bf16.vlgmr.msra.gmra.mrb[20].mxu1 %vm1030_vm5, %v1310_v57  ;;  %v628_v18 = vrot.slane %v2691_v9, 1  ;;  %v246_v44 = vsel %vm245_vm2, %v233_v8, 0.0  ;;  %v1311_v60 = vpack.c.bf16 %v2165_v41, %v2165_v41 }
 0x297   : > { %v2167_v13 = vpop.eup %2166  ;;  %2122 = vmatprep.mubr.msk.bf16.mxu1 %vm2257_vm0, %v2256_v0  ;;  %v1165_v58 = vmul.f32 1.442695, %v1150_v17  ;;  %v1230_v8 = vsel %vm1030_vm5, %v2644_v53, 0.0  ;;  %v1197_v53 = vsub.f32 %v2560_v32, %v1173_v30  ;;  %v1223_v32 = vmul.f32 1.442695, %v1201_v7 }
 0x298   : > { %v2701_v11 = vpop.permute.xlu0 %201  ;;  %v1242_v19 = vsel %vm1030_vm5, %v2167_v13, 0.0  ;;  %v1312_v16 = vpack.c.bf16 %v2167_v13, %v2167_v13  ;;  %v280_v13 = vsel %vm252_vm4, %v2441_v55, 0.0 }
 0x299   : > { %v629_v23 = vrot.slane %v2701_v11, 1  ;;  %1243 = vadd.xlane.f32.xlu1 %v1242_v19  ;;  %v2705_v54 = vpop.permute.xlu1 %203  ;;  %2170 = vpow2.f32 %v1165_v58 }
 0x29a   : > { %v631_v49 = vrot.slane %v2705_v54, 1  ;;  %2172 = vpow2.f32 %v1209_v22 }
 0x29b   : > { %v630_v1 = vsel %vm545_vm1, %v628_v18, %v629_v23 }
 0x29c   : > { %v2713_v31 = vpop.permute.xlu0 %208  ;;  %v650_v33 = vpack.c.bf16 %v630_v1, %v630_v1  ;;  %v632_v15 = vsel %vm545_vm1, %v629_v23, %v631_v49  ;;  %v234_v23 = vmul.f32 %v2696_v26, %v2299_v3 }
 0x29d   : > { %1228 = vadd.xlane.f32.xlu1 %v1227_v51  ;;  %v633_v10 = vrot.slane %v2713_v31, 1  ;;  %v2717_v29 = vpop.permute.xlu1 %210  ;;  %v651_v48 = vpack.c.bf16 %v632_v15, %v632_v15  ;;  %v1195_v51 = vsub.f32 %v2551_v20, %v2580_v61  ;;  %v1198_v15 = vsub.f32 %v2562_v56, %v2592_v28 }
 0x29e   : > { %v1504_v62 = vsel %vm1318_vm7, %v650_v33, 0  ;;  %v634_v2 = vrot.slane %v2717_v29, 1  ;;  %v1215_v33 = vmul.f32 1.442695, %v1197_v53  ;;  %v1221_v20 = vmul.f32 1.442695, %v2604_v47 }
 0x29f   : > { %2115 = vmatpush3.bf16.msra.mxu0 %v1504_v62  ;;  %v1550_v46 = vsel %vm1318_vm7, %v651_v48, 0  ;;  %v1211_v3 = vmul.f32 1.442695, %v1195_v51  ;;  %v1219_v48 = vmul.f32 1.442695, %v2594_v35 }
 0x2a0   : > { %v2169_v34 = vpop.eup %2168  ;;  %2121 = vmatpush3.bf16.msra.mxu1 %v1550_v46  ;;  %v2726_v37 = vpop.permute.xlu0 %212  ;;  %2126 = vmatprep.subr.bf16.mxu0 %v2256_v0  ;;  %v635_v50 = vsel %vm545_vm1, %v633_v10, %v634_v2  ;;  %v1217_v10 = vmul.f32 1.442695, %v1198_v15  ;;  %v2973_v46 = vrot.slane %v2568_v36, 7 }
 0x2a1   : > { %v636_v42 = vrot.slane %v2726_v37, 1  ;;  %247 = vadd.xlane.f32.xlu1 %v246_v44  ;;  %v1245_v57 = vsel %vm1030_vm5, %v2169_v34, 0.0  ;;  %v652_v17 = vpack.c.bf16 %v635_v50, %v635_v50  ;;  %2132 = vmatprep.subr.bf16.mxu1 %v2256_v0  ;;  %v1313_v49 = vpack.c.bf16 %v2169_v34, %v2169_v34 }
 0x2a2   : > { %1246 = vadd.xlane.f32.xlu0 %v1245_v57  ;;  %2117 = vmatmul.mubr.msk.bf16.vlgmr.msra.gmra.mrb[24].mxu0 %vm1030_vm5, %v1311_v60  ;;  %2174 = vpow2.f32 %v1211_v3  ;;  %v1196_v34 = vsub.f32 %v2553_v21, %v2973_v46 }
 0x2a3   : > { %2123 = vmatmul.mubr.msk.bf16.vlgmr.msra.gmra.mrb[24].mxu1 %vm1030_vm5, %v1312_v16  ;;  %v1596_v38 = vsel %vm1318_vm7, %v652_v17, 0  ;;  %v637_v41 = vsel %vm545_vm1, %v634_v2, %v636_v42  ;;  %2128 = vmatprep.mubr.msk.bf16.mxu0 %vm2257_vm0, %v2256_v0  ;;  %v2171_v58 = vpop.eup %2170  ;;  %2176 = vpow2.f32 %v1215_v33 }
 0x2a4   : > { %2127 = vmatpush3.bf16.msra.mxu0 %v1596_v38  ;;  %v653_v18 = vpack.c.bf16 %v637_v41, %v637_v41  ;;  %2134 = vmatprep.mubr.msk.bf16.mxu1 %vm2257_vm0, %v2256_v0  ;;  %v1314_v1 = vpack.c.bf16 %v2171_v58, %v2171_v58  ;;  %v249_v0 = vsel %vm245_vm2, %v234_v23, 0.0  ;;  %v2751_v55 = vpop.eup %2172  ;;  %2178 = vpow2.f32 %v1217_v10 }
 0x2a5   : > { %2180 = vpow2.f32 %v1219_v48  ;;  %v1248_v42 = vsel %vm1030_vm5, %v2171_v58, 0.0  ;;  %v1213_v41 = vmul.f32 1.442695, %v1196_v34 }
 0x2a6   : > { %281 = vadd.xlane.f32.xlu0 %v280_v13  ;;  %v1642_v19 = vsel %vm1318_vm7, %v653_v18, 0  ;;  %2182 = vpow2.f32 %v1221_v20 }
 0x2a7   : > { %2133 = vmatpush3.bf16.msra.mxu1 %v1642_v19  ;;  %2184 = vpow2.f32 %v1223_v32 }
 0x2a8   : > { %2186 = vpow2.f32 %v1225_v5 }
 0x2a9   : > { %2188 = vpow2.f32 %v1213_v41 }
 0x2aa   : > { %1231 = vadd.xlane.f32.xlu0 %v1230_v8  ;;  %2129 = vmatmul.mubr.msk.bf16.vlgmr.msra.gmra.mrb[28].mxu0 %vm1030_vm5, %v1313_v49 }
 0x2ab   : > { %2135 = vmatmul.mubr.msk.bf16.vlgmr.msra.gmra.mrb[28].mxu1 %vm1030_vm5, %v1314_v1 }
 0x2ac   : > { %v2762_v62 = vpop.eup %2174 }
 0x2ad   : > { %v2766_v61 = vpop.eup %2176 }
 0x2ae   : > { %250 = vadd.xlane.f32.xlu0 %v249_v0  ;;  %v2772_v56 = vpop.eup %2178 }
 0x2af   : > { %v2776_v28 = vpop.eup %2180 }
 0x2b0   : > { %v2779_v59 = vpop.eup %2182 }
 0x2b1   : > { %v2787_v17 = vpop.eup %2184 }
 0x2b2   : > { %1697 = vperm.xlu1 %2154, %v2751_v55   ;;  %v2791_v19 = vpop.eup %2186 }
 0x2b3   : > { %v2794_v5 = vpop.eup %2188 }
 0x2c4   : > { %1701 = vperm.xlu0 %2155, %v2762_v62  }
 0x2c8   : > { %1709 = vperm.xlu0 %2155, %v2766_v61  }
 0x2cc   : > { %1713 = vperm.xlu0 %2155, %v2772_v56  }
 0x2cd   : > { %v258_v30 = vpop.xlane.xlu0 %257 }
 0x2ce   : > { %v286_v35 = vmul.f32 0.17677669, %v258_v30 }
 0x2cf   : > { %v261_v47 = vpop.xlane.xlu1 %260 }
 0x2d0   : > { %v287_v2 = vmul.f32 0.17677669, %v261_v47  ;;  %1717 = vperm.xlu0 %2155, %v2776_v28  }
 0x2d1   : > { %v264_v44 = vpop.xlane.xlu0 %263 }
 0x2d2   : > { %v305_v27 = vmax.f32 %v286_v35, %v287_v2  ;;  %v288_v43 = vmul.f32 0.17677669, %v264_v44 }
 0x2d3   : > { %v267_v7 = vpop.xlane.xlu1 %266 }
 0x2d4   : > { %v306_v63 = vsel %vm296_vm6, %v288_v43, -inf  ;;  %1721 = vperm.xlu0 %2155, %v2779_v59   ;;  %v289_v57 = vmul.f32 0.17677669, %v267_v7 }
 0x2d5   : > { %v307_v60 = vmax.f32 %v305_v27, %v306_v63  ;;  %v270_v50 = vpop.xlane.xlu0 %269 }
 0x2d6   : > { %v290_v16 = vmul.f32 0.17677669, %v270_v50  ;;  %1249 = vadd.xlane.f32.xlu1 %v1248_v42 }
 0x2d7   : > { %v308_v22 = vrot.slane %v307_v60, 4  ;;  %v273_v38 = vpop.xlane.xlu1 %272 }
 0x2d8   : > { %v314_v18 = vmax.f32 %v289_v57, %v290_v16  ;;  %v291_v36 = vmul.f32 0.17677669, %v273_v38  ;;  %1725 = vperm.xlu0 %2155, %v2787_v17  }
 0x2d9   : > { %v309_v21 = vmax.f32 %v307_v60, %v308_v22 }
 0x2da   : > { %v315_v13 = vsel %vm296_vm6, %v291_v36, -inf }
 0x2db   : > { %v310_v23 = vrot.slane %v309_v21, 2  ;;  %v316_v49 = vmax.f32 %v314_v18, %v315_v13 }
 0x2dc   : > { %1729 = vperm.xlu0 %2155, %v2791_v19  }
 0x2dd   : > { %v311_v58 = vmax.f32 %v309_v21, %v310_v23  ;;  %v317_v8 = vrot.slane %v316_v49, 4 }
 0x2df   : > { %v312_v1 = vrot.slane %v311_v58, 1  ;;  %v318_v0 = vmax.f32 %v316_v49, %v317_v8 }
 0x2e1   : > { %v313_v51 = vmax.f32 %v311_v58, %v312_v1  ;;  %v319_v3 = vrot.slane %v318_v0, 2 }
 0x2e3   : > { %v335_v53 = vsub.f32 %v286_v35, %v313_v51  ;;  %v336_v33 = vsub.f32 %v287_v2, %v313_v51  ;;  %v337_v15 = vsub.f32 %v288_v43, %v313_v51  ;;  %v320_v10 = vmax.f32 %v318_v0, %v319_v3 }
 0x2e5   : > { %v350_v48 = vmul.f32 1.442695, %v335_v53  ;;  %v352_v20 = vmul.f32 1.442695, %v336_v33  ;;  %v354_v32 = vmul.f32 1.442695, %v337_v15 }
 0x2e6   : > { %v321_v30 = vrot.slane %v320_v10, 1 }
 0x2e7   : > { %2190 = vpow2.f32 %v350_v48  ;;  %1705 = vperm.xlu1 %2154, %v2794_v5  }
 0x2e8   : > { %2192 = vpow2.f32 %v352_v20  ;;  %v322_v47 = vmax.f32 %v320_v10, %v321_v30 }
 0x2e9   : > { %2194 = vpow2.f32 %v354_v32 }
 0x2ea   : > { %v338_v44 = vsub.f32 %v289_v57, %v322_v47  ;;  %v339_v27 = vsub.f32 %v290_v16, %v322_v47  ;;  %v340_v7 = vsub.f32 %v291_v36, %v322_v47 }
 0x2ec   : > { %v356_v46 = vmul.f32 1.442695, %v338_v44  ;;  %v358_v35 = vmul.f32 1.442695, %v339_v27  ;;  %v360_v2 = vmul.f32 1.442695, %v340_v7 }
 0x2ee   : > { %2196 = vpow2.f32 %v356_v46 }
 0x2ef   : > { %2198 = vpow2.f32 %v358_v35 }
 0x2f0   : > { %2200 = vpow2.f32 %v360_v2 }
 0x2f1   : > { %v2191_v43 = vpop.eup %2190 }
 0x2f2   : > { %v2193_v34 = vpop.eup %2192  ;;  %v411_v63 = vmul.f32 %v2191_v43, %v2608_v45 }
 0x2f3   : > { %v2195_v60 = vpop.eup %2194  ;;  %v377_v50 = vadd.f32 %v2193_v34, %v2191_v43  ;;  %v412_v42 = vmul.f32 %v2193_v34, %v2622_v4 }
 0x2f4   : > { %v378_v22 = vsel %vm296_vm6, %v2195_v60, 0.0  ;;  %v413_v57 = vmul.f32 %v2195_v60, %v2675_v24  ;;  %v431_v16 = vsel %vm245_vm2, %v411_v63, 0.0 }
 0x2f5   : > { %v379_v38 = vadd.f32 %v378_v22, %v377_v50  ;;  %v432_v41 = vsel %vm245_vm2, %v412_v42, 0.0 }
 0x2f6   : > { %v433_v18 = vadd.f32 %v432_v41, %v431_v16  ;;  %v434_v21 = vsel %vm252_vm4, %v413_v57, 0.0 }
 0x2f7   : > { %v380_v36 = vrot.slane %v379_v38, 4  ;;  %v2804_v13 = vpop.f32.mrb[16].mxu0 }
 0x2f8   : > { %v2197_v23 = vpop.eup %2196  ;;  %v2094_v49 = vpop.f32.mrb[17].mxu0  ;;  %v435_v58 = vadd.f32 %v434_v21, %v433_v18 }
 0x2f9   : > { %v2199_v8 = vpop.eup %2198  ;;  %v381_v4 = vadd.f32 %v380_v36, %v379_v38  ;;  %v1359_v1 = vpop.f32.mrb[18].mxu0  ;;  %v414_v0 = vmul.f32 %v2197_v23, %v2691_v9  ;;  %v2244_v38 = vld [vmem:[%s2292_s11 + $0x38] sm:$0x1] }
 0x2fa   : > { %v2201_v24 = vpop.eup %2200  ;;  %v386_v51 = vadd.f32 %v2199_v8, %v2197_v23  ;;  %v2095_v3 = vpop.f32.mrb[19].mxu0  ;;  %v436_v53 = vrot.slane %v435_v58, 4  ;;  %v415_v33 = vmul.f32 %v2199_v8, %v2701_v11  ;;  %v235_v41 = vmul.f32 %v2244_v38, %v2696_v26 }
 0x2fb   : > { %v382_v15 = vrot.slane %v381_v4, 2  ;;  %v387_v10 = vsel %vm296_vm6, %v2201_v24, 0.0  ;;  %v416_v48 = vmul.f32 %v2201_v24, %v2705_v54  ;;  %v442_v20 = vsel %vm245_vm2, %v414_v0, 0.0  ;;  %v279_v26 = vpop.xlane.xlu1 %278 }
 0x2fc   : > { %v388_v32 = vadd.f32 %v387_v10, %v386_v51  ;;  %v437_v30 = vadd.f32 %v436_v53, %v435_v58  ;;  %v443_v47 = vsel %vm245_vm2, %v415_v33, 0.0  ;;  %v253_v23 = vsel %vm252_vm4, %v235_v41, 0.0  ;;  %v276_v10 = vpop.xlane.xlu0 %275 }
 0x2fd   : > { %v383_v44 = vadd.f32 %v382_v15, %v381_v4  ;;  %v444_v27 = vadd.f32 %v443_v47, %v442_v20  ;;  %v445_v46 = vsel %vm252_vm4, %v416_v48, 0.0  ;;  %v1268_v33 = vrot.slane %v2751_v55, 1 }
 0x2fe   : > { %v389_v7 = vrot.slane %v388_v32, 4  ;;  %v438_v63 = vrot.slane %v437_v30, 2  ;;  %v1269_v15 = vrot.slane %v2762_v62, 1  ;;  %v2974_v47 = vrot.slane %v2512_v39, 7 }
 0x2ff   : > { %v2813_v35 = vpop.f32.mrb[16].mxu1  ;;  %v384_v11 = vrot.slane %v383_v44, 1  ;;  %v446_v2 = vadd.f32 %v445_v46, %v444_v27  ;;  %v1274_v46 = vrot.slane %v2772_v56, 1  ;;  %v1192_v62 = vsub.f32 %v2497_v14, %v2525_v52 }
 0x300   : > { %v390_v43 = vadd.f32 %v389_v7, %v388_v32  ;;  %v2100_v34 = vpop.f32.mrb[17].mxu1  ;;  %v439_v18 = vadd.f32 %v438_v63, %v437_v30  ;;  %v1270_v48 = vsel %vm545_vm1, %v1268_v33, %v1269_v15  ;;  %v1271_v32 = vrot.slane %v2794_v5, 1 }
 0x301   : > { %v1405_v54 = vpop.f32.mrb[18].mxu1  ;;  %v385_v60 = vadd.f32 %v384_v11, %v383_v44  ;;  %v447_v50 = vrot.slane %v446_v2, 4  ;;  %v1193_v44 = vsub.f32 %v2495_v12, %v2974_v47  ;;  %v1273_v11 = vrot.slane %v2766_v61, 1 }
 0x302   : > { %v391_v42 = vrot.slane %v390_v43, 2  ;;  %v2101_v22 = vpop.f32.mrb[19].mxu1  ;;  %v440_v49 = vrot.slane %v439_v18, 1  ;;  %v1272_v27 = vsel %vm545_vm1, %v1269_v15, %v1271_v32  ;;  %v1276_v39 = vrot.slane %v2776_v28, 1 }
 0x303   : > { %2202 = vrcp.f32 %v385_v60  ;;  %v448_v57 = vadd.f32 %v447_v50, %v446_v2  ;;  %v1207_v2 = vmul.f32 1.442695, %v1193_v44  ;;  %v1275_v5 = vsel %vm545_vm1, %v1273_v11, %v1274_v46 }
 0x304   : > { %v392_v16 = vadd.f32 %v391_v42, %v390_v43  ;;  %v441_v4 = vadd.f32 %v440_v49, %v439_v18  ;;  %v1205_v12 = vmul.f32 1.442695, %v1192_v62  ;;  %v1277_v56 = vsel %vm545_vm1, %v1274_v46, %v1276_v39 }
 0x305   : > { %v449_v21 = vrot.slane %v448_v57, 2  ;;  %v1279_v52 = vrot.slane %v2787_v17, 1  ;;  %v1278_v61 = vrot.slane %v2779_v59, 1  ;;  %v292_v18 = vmul.f32 0.17677669, %v276_v10 }
 0x306   : > { %v393_v36 = vrot.slane %v392_v16, 1 }
 0x307   : > { %v450_v8 = vadd.f32 %v449_v21, %v448_v57  ;;  %v1280_v28 = vsel %vm545_vm1, %v1278_v61, %v1279_v52 }
 0x308   : > { %v394_v58 = vadd.f32 %v393_v36, %v392_v16  ;;  %v293_v16 = vmul.f32 0.17677669, %v279_v26 }
 0x309   : > { %v451_v24 = vrot.slane %v450_v8, 1 }
 0x30a   : > { %2204 = vrcp.f32 %v394_v58  ;;  %v323_v49 = vmax.f32 %v292_v18, %v293_v16 }
 0x30b   : > { %254 = vadd.xlane.f32.xlu1 %v253_v23  ;;  %v452_v51 = vadd.f32 %v451_v24, %v450_v8 }
 0x30d   : > { %v2203_v1 = vpop.eup %2202 }
 0x30e   : > { %v2818_v0 = vmul.f32 %v2203_v1, %v441_v4 }
 0x314   : > { %v2205_v3 = vpop.eup %2204 }
 0x315   : > { %v2820_v53 = vmul.f32 %v2205_v3, %v452_v51 }
 0x31a   : > { %v1235_v20 = vpop.xlane.xlu1 %1234 }
 0x31b   : > { %v1293_v30 = vadd.f32 %v1270_v48, %v1235_v20 }
 0x31d   : > { %2206 = vrcp.f32 %v1293_v30 }
 0x31e   : > { %v1238_v7 = vpop.xlane.xlu0 %1237 }
 0x31f   : > { %v1294_v55 = vadd.f32 %v1272_v27, %v1238_v7 }
 0x321   : > { %2208 = vrcp.f32 %v1294_v55 }
 0x322   : > { %v1241_v43 = vpop.xlane.xlu0 %1240 }
 0x323   : > { %v1295_v34 = vadd.f32 %v1275_v5, %v1241_v43 }
 0x325   : > { %2210 = vrcp.f32 %v1295_v34  ;;  %v2975_v34 = vrot.slane %v2514_v40, 7 }
 0x326   : > { %2212 = vpow2.f32 %v1207_v2  ;;  %v1244_v63 = vpop.xlane.xlu1 %1243 }
 0x327   : > { %v2207_v54 = vpop.eup %2206  ;;  %v1296_v60 = vadd.f32 %v1277_v56, %v1244_v63  ;;  %2214 = vpow2.f32 %v1205_v12  ;;  %v1191_v12 = vsub.f32 %v2493_v6, %v2975_v34 }
 0x328   : > { %1820 = vperm.xlu0 %2155, %v2207_v54  }
 0x329   : > { %2216 = vrcp.f32 %v1296_v60 }
 0x32a   : > { %v2844_v36 = vpop.xlane.xlu1 %1228 }
 0x32b   : > { %v2209_v14 = vpop.eup %2208 }
 0x32c   : > { %1825 = vperm.xlu0 %2155, %v2209_v14  }
 0x32e   : > { %v248_v3 = vpop.xlane.xlu1 %247 }
 0x32f   : > { %v2211_v50 = vpop.eup %2210  ;;  %v1247_v42 = vpop.xlane.xlu0 %1246  ;;  %v2851_v48 = vmul.f32 0.17677669, %v248_v3 }
 0x330   : > { %v2213_v22 = vpop.eup %2212  ;;  %v1297_v57 = vadd.f32 %v1280_v28, %v1247_v42  ;;  %1830 = vperm.xlu0 %2155, %v2211_v50   ;;  %v2867_v42 = vrot.slane %v2608_v45, %v2350_v25 }
 0x331   : > { %v2842_v38 = vpop.eup %2214  ;;  %v1266_v23 = vrot.slane %v2213_v22, 1 }
 0x332   : > { %2218 = vrcp.f32 %v1297_v57  ;;  %v1264_v58 = vrot.slane %v2842_v38, 1  ;;  %v1698_v57 = vpop.permute.xlu1 %1697 }
 0x333   : > { %v2217_v41 = vpop.eup %2216  ;;  %v282_v21 = vpop.xlane.xlu0 %281 }
 0x334   : > { %v294_v59 = vmul.f32 0.17677669, %v282_v21  ;;  %1835 = vperm.xlu1 %2154, %v2217_v41   ;;  %v1267_v1 = vsel %vm545_vm1, %v1264_v58, %v1266_v23  ;;  %v1751_v21 = vmul.f32 %v2867_v42, %v1698_v57 }
 0x336   : > { %v324_v8 = vsel %vm296_vm6, %v294_v59, -inf }
 0x337   : > { %v325_v4 = vmax.f32 %v323_v49, %v324_v8  ;;  %v1232_v24 = vpop.xlane.xlu0 %1231 }
 0x338   : > { %v1292_v51 = vadd.f32 %v1267_v1, %v1232_v24  ;;  %1693 = vperm.xlu1 %2154, %v2213_v22   ;;  %v1203_v22 = vmul.f32 1.442695, %v1191_v12  ;;  %v1281_v24 = vrot.slane %v2791_v19, 1 }
 0x339   : > { %v326_v26 = vrot.slane %v325_v4, 4 }
 0x33a   : > { %2220 = vrcp.f32 %v1292_v51 }
 0x33b   : > { %v327_v33 = vmax.f32 %v325_v4, %v326_v26  ;;  %v251_v15 = vpop.xlane.xlu0 %250  ;;  %v1777_v4 = vrot.slane %v1751_v21, 1 }
 0x33c   : > { %v2219_v10 = vpop.eup %2218  ;;  %v2853_v20 = vmul.f32 0.17677669, %v251_v15 }
 0x33d   : > { %v328_v32 = vrot.slane %v327_v33, 2  ;;  %1840 = vperm.xlu0 %2155, %v2219_v10  }
 0x33e   : > { %v295_v30 = vmax.f32 %v2851_v48, %v2853_v20 }
 0x33f   : > { %v329_v47 = vmax.f32 %v327_v33, %v328_v32 }
 0x341   : > { %v330_v44 = vrot.slane %v329_v47, 1 }
 0x343   : > { %v331_v27 = vmax.f32 %v329_v47, %v330_v44  ;;  %v1702_v50 = vpop.permute.xlu0 %1701  ;;  %v1282_v47 = vsel %vm545_vm1, %v1279_v52, %v1281_v24 }
 0x344   : > { %v2221_v7 = vpop.eup %2220 }
 0x345   : > { %v341_v46 = vsub.f32 %v292_v18, %v331_v27  ;;  %v342_v55 = vsub.f32 %v293_v16, %v331_v27  ;;  %v343_v62 = vsub.f32 %v294_v59, %v331_v27  ;;  %1815 = vperm.xlu1 %2154, %v2221_v7   ;;  %v2872_v18 = vmul.f32 %v2867_v42, %v1702_v50 }
 0x347   : > { %v362_v11 = vmul.f32 1.442695, %v341_v46  ;;  %v364_v2 = vmul.f32 1.442695, %v342_v55  ;;  %v366_v5 = vmul.f32 1.442695, %v343_v62 }
 0x348   : > { %v1778_v49 = vrot.slane %v2872_v18, 1 }
 0x349   : > { %2222 = vpow2.f32 %v362_v11 }
 0x34a   : > { %2224 = vpow2.f32 %v364_v2  ;;  %v1779_v3 = vsel %vm545_vm1, %v1777_v4, %v1778_v49 }
 0x34b   : > { %2226 = vpow2.f32 %v366_v5 }
 0x34c   : > { %2228 = vpow2.f32 %v1203_v22 }
 0x353   : > { %v2223_v43 = vpop.eup %2222 }
 0x354   : > { %v2225_v39 = vpop.eup %2224  ;;  %v417_v63 = vmul.f32 %v2223_v43, %v2713_v31 }
 0x355   : > { %v2227_v56 = vpop.eup %2226  ;;  %v395_v54 = vadd.f32 %v2225_v39, %v2223_v43  ;;  %v418_v60 = vmul.f32 %v2225_v39, %v2717_v29 }
 0x356   : > { %v396_v14 = vsel %vm296_vm6, %v2227_v56, 0.0  ;;  %v419_v61 = vmul.f32 %v2227_v56, %v2726_v37  ;;  %v453_v28 = vsel %vm245_vm2, %v417_v63, 0.0  ;;  %v2229_v19 = vpop.eup %2228 }
 0x357   : > { %v397_v40 = vadd.f32 %v396_v14, %v395_v54  ;;  %v454_v6 = vsel %vm245_vm2, %v418_v60, 0.0  ;;  %v1263_v62 = vrot.slane %v2229_v19, 1 }
 0x358   : > { %v455_v16 = vadd.f32 %v454_v6, %v453_v28  ;;  %v456_v29 = vsel %vm252_vm4, %v419_v61, 0.0 }
 0x359   : > { %v398_v41 = vrot.slane %v397_v40, 4  ;;  %v1265_v17 = vsel %vm545_vm1, %v1263_v62, %v1264_v58 }
 0x35a   : > { %v457_v37 = vadd.f32 %v456_v29, %v455_v16  ;;  %v1291_v52 = vadd.f32 %v1265_v17, %v2844_v36 }
 0x35b   : > { %v399_v23 = vadd.f32 %v398_v41, %v397_v40 }
 0x35c   : > { %v458_v59 = vrot.slane %v457_v37, 4 }
 0x35d   : > { %v400_v45 = vrot.slane %v399_v23, 2 }
 0x35e   : > { %v459_v8 = vadd.f32 %v458_v59, %v457_v37 }
 0x35f   : > { %v401_v1 = vadd.f32 %v400_v45, %v399_v23  ;;  %v1710_v23 = vpop.permute.xlu0 %1709 }
 0x360   : > { %v460_v10 = vrot.slane %v459_v8, 2 }
 0x361   : > { %v1448_v51 = vpop.f32.mrb[20].mxu0  ;;  %v402_v26 = vrot.slane %v401_v1, 1 }
 0x362   : > { %v2880_v33 = vadd.f32 %v1779_v3, %v1448_v51  ;;  %v2106_v15 = vpop.f32.mrb[21].mxu0  ;;  %v461_v55 = vadd.f32 %v460_v10, %v459_v8 }
 0x363   : > { %v1451_v32 = vpop.f32.mrb[22].mxu0  ;;  %v1250_v44 = vpop.xlane.xlu1 %1249  ;;  %v403_v27 = vadd.f32 %v402_v26, %v401_v1 }
 0x364   : > { %v1298_v7 = vadd.f32 %v1282_v47, %v1250_v44  ;;  %v2107_v46 = vpop.f32.mrb[23].mxu0  ;;  %v462_v5 = vrot.slane %v461_v55, 1  ;;  %v1714_v59 = vpop.permute.xlu0 %1713  ;;  %v1743_v44 = vrot.slane %v2691_v9, %v2350_v25 }
 0x365   : > { %2230 = vrcp.f32 %v403_v27 }
 0x366   : > { %2232 = vrcp.f32 %v1298_v7  ;;  %v463_v34 = vadd.f32 %v462_v5, %v461_v55  ;;  %v1755_v46 = vmul.f32 %v1743_v44, %v1714_v59 }
 0x367   : > { %2234 = vrcp.f32 %v1291_v52  ;;  %v1706_v8 = vpop.permute.xlu1 %1705 }
 0x368   : > { %v1718_v45 = vpop.permute.xlu0 %1717  ;;  %v1753_v26 = vmul.f32 %v2867_v42, %v1706_v8  ;;  %v1783_v5 = vrot.slane %v1755_v46, 1 }
 0x369   : > { %v1494_v11 = vpop.f32.mrb[20].mxu1 }
 0x36a   : > { %v2112_v2 = vpop.f32.mrb[21].mxu1  ;;  %v1780_v32 = vrot.slane %v1753_v26, 1 }
 0x36b   : > { %v1497_v43 = vpop.f32.mrb[22].mxu1 }
 0x36c   : > { %v2113_v39 = vpop.f32.mrb[23].mxu1  ;;  %v1722_v4 = vpop.permute.xlu0 %1721  ;;  %v1756_v43 = vmul.f32 %v1743_v44, %v1718_v45 }
 0x36f   : > { %v2231_v12 = vpop.eup %2230 }
 0x370   : > { %v2233_v63 = vpop.eup %2232  ;;  %v2889_v56 = vmul.f32 %v2231_v12, %v463_v34  ;;  %v1726_v3 = vpop.permute.xlu0 %1725 }
 0x371   : > { %1845 = vperm.xlu0 %2155, %v2233_v63   ;;  %v2235_v36 = vpop.eup %2234 }
 0x374   : > { %v2905_v27 = vpop.permute.xlu0 %1729 }
 0x375   : > { %v1540_v54 = vpop.f32.mrb[24].mxu0  ;;  %1685 = vperm.xlu0 %2155, %v2229_v19   ;;  %v1781_v19 = vsel %vm545_vm1, %v1778_v49, %v1780_v32 }
 0x376   : > { %v2118_v60 = vpop.f32.mrb[25].mxu0  ;;  %v2891_v14 = vpop.f32.mrb[24].mxu1  ;;  %v1803_v39 = vadd.f32 %v1781_v19, %v1494_v11 }
 0x377   : > { %v1543_v61 = vpop.f32.mrb[26].mxu0  ;;  %v2124_v50 = vpop.f32.mrb[25].mxu1 }
 0x378   : > { %v2119_v28 = vpop.f32.mrb[27].mxu0  ;;  %v1589_v40 = vpop.f32.mrb[26].mxu1  ;;  %v1785_v50 = vrot.slane %v1756_v43, 1 }
 0x379   : > { %v2125_v6 = vpop.f32.mrb[27].mxu1  ;;  %1689 = vperm.xlu0 %2155, %v2842_v38  }
 0x37d   : > { %v2894_v58 = vpop.f32.mrb[28].mxu0  ;;  %1810 = vperm.xlu0 %2155, %v2235_v36  }
 0x37e   : > { %v2130_v22 = vpop.f32.mrb[29].mxu0  ;;  %v2896_v57 = vpop.f32.mrb[28].mxu1 }
 0x37f   : > { %v1635_v16 = vpop.f32.mrb[30].mxu0  ;;  %v2136_v41 = vpop.f32.mrb[29].mxu1  ;;  %v1786_v22 = vsel %vm545_vm1, %v1783_v5, %v1785_v50 }
 0x380   : > { %v2131_v29 = vpop.f32.mrb[31].mxu0  ;;  %v1681_v37 = vpop.f32.mrb[30].mxu1 }
 0x381   : > { %v2137_v21 = vpop.f32.mrb[31].mxu1 }
 0x398   : > { %v255_v1 = vpop.xlane.xlu1 %254 }
 0x399   : > { %v285_v24 = vmul.f32 0.17677669, %v255_v1 }
 0x39b   : > { %v297_v38 = vsel %vm296_vm6, %v285_v24, -inf }
 0x39c   : > { %v298_v51 = vmax.f32 %v295_v30, %v297_v38  ;;  %v1754_v30 = vmul.f32 %v1743_v44, %v1710_v23 }
 0x39e   : > { %v299_v15 = vrot.slane %v298_v51, 4  ;;  %v1782_v12 = vrot.slane %v1754_v30, 1 }
 0x3a0   : > { %v300_v10 = vmax.f32 %v298_v51, %v299_v15  ;;  %v1784_v28 = vsel %vm545_vm1, %v1782_v12, %v1783_v5 }
 0x3a1   : > { %v1804_v40 = vadd.f32 %v1784_v28, %v1540_v54 }
 0x3a2   : > { %v301_v47 = vrot.slane %v300_v10, 2 }
 0x3a4   : > { %v302_v7 = vmax.f32 %v300_v10, %v301_v47  ;;  %v2247_v10 = vld [vmem:[%s2292_s11 + $0x40] sm:$0x1] }
 0x3a6   : > { %v303_v55 = vrot.slane %v302_v7, 1 }
 0x3a7   : > { %v1821_v62 = vpop.permute.xlu0 %1820 }
 0x3a8   : > { %v304_v2 = vmax.f32 %v302_v7, %v303_v55  ;;  %v1850_v42 = vmul.f32 %v1821_v62, %v2880_v33 }
 0x3aa   : > { %v332_v17 = vsub.f32 %v2851_v48, %v304_v2  ;;  %v333_v9 = vsub.f32 %v2853_v20, %v304_v2  ;;  %v334_v52 = vsub.f32 %v285_v24, %v304_v2  ;;  %v1867_v34 = vrot.slane %v1850_v42, 7 }
 0x3ab   : > { %v1826_v63 = vpop.permute.xlu0 %1825  ;;  %v1747_v20 = vrot.slane %v2713_v31, %v2350_v25 }
 0x3ac   : > { %v344_v18 = vmul.f32 1.442695, %v332_v17  ;;  %v346_v60 = vmul.f32 1.442695, %v333_v9  ;;  %v348_v49 = vmul.f32 1.442695, %v334_v52  ;;  %v1851_v61 = vmul.f32 %v1826_v63, %v1803_v39 }
 0x3ad   : > { %v1883_v33 = vsel %vm296_vm6, %v2818_v0, %v1867_v34  ;;  %v1758_v16 = vmul.f32 %v1747_v20, %v1726_v3  ;;  %v1805_v0 = vadd.f32 %v1786_v22, %v2891_v14  ;;  %v1757_v29 = vmul.f32 %v1747_v20, %v1722_v4  ;;  %v2245_v4 = vld [vmem:[%s2292_s11 + $0x10] sm:$0xff]  ;;  %v2246_v3 = vld [vmem:[%s2292_s11 + $0x28] sm:$0xff] }
 0x3ae   : > { %2236 = vpow2.f32 %v344_v18  ;;  %v1868_v11 = vrot.slane %v1851_v61, 7  ;;  %v1759_v50 = vmul.f32 %v1747_v20, %v2905_v27 }
 0x3af   : > { %2238 = vpow2.f32 %v346_v60  ;;  %v1831_v48 = vpop.permute.xlu0 %1830  ;;  %v1788_v21 = vrot.slane %v1758_v16, 1  ;;  %v1787_v45 = vrot.slane %v1757_v29, 1 }
 0x3b0   : > { %2240 = vpow2.f32 %v348_v49  ;;  %v1852_v6 = vmul.f32 %v1831_v48, %v1804_v40  ;;  %1891 = vrot.lane.b32.xlu0 %v1868_v11, %s2260_s14  ;;  %v1869_v36 = vsel %vm296_vm6, %v1867_v34, %v1868_v11  ;;  %v1790_v28 = vrot.slane %v1759_v50, 1 }
 0x3b1   : > { %1889 = vrot.lane.b32.xlu1 %v1869_v36, %s2260_s14  ;;  %v1789_v38 = vsel %vm545_vm1, %v1787_v45, %v1788_v21  ;;  %v1735_v48 = vrot.slane %v2245_v4, %v2350_v25 }
 0x3b2   : > { %v1870_v54 = vrot.slane %v1852_v6, 7  ;;  %v1806_v26 = vadd.f32 %v1789_v38, %v2894_v58 }
 0x3b3   : > { %v1836_v41 = vpop.permute.xlu1 %1835 }
 0x3b4   : > { %v1853_v37 = vmul.f32 %v1836_v41, %v1805_v0  ;;  %1887 = vrot.lane.b32.xlu0 %v1883_v33, %s2260_s14  ;;  %v1884_v31 = vsel %vm296_vm6, %v2820_v53, %v1870_v54 }
 0x3b6   : > { %v1871_v23 = vrot.slane %v1853_v37, 7 }
 0x3b7   : > { %v1694_v36 = vpop.permute.xlu1 %1693 }
 0x3b8   : > { %v2237_v59 = vpop.eup %2236  ;;  %1901 = vrot.lane.b32.xlu1 %v1871_v23, %s2259_s13  ;;  %v1872_v8 = vsel %vm296_vm6, %v1870_v54, %v1871_v23  ;;  %v1750_v0 = vmul.f32 %v1735_v48, %v1694_v36 }
 0x3b9   : > { %v2239_v14 = vpop.eup %2238  ;;  %1899 = vrot.lane.b32.xlu0 %v1872_v8, %s2259_s13  ;;  %v408_v1 = vmul.f32 %v2245_v4, %v2237_v59 }
 0x3ba   : > { %v2241_v24 = vpop.eup %2240  ;;  %v368_v51 = vadd.f32 %v2239_v14, %v2237_v59  ;;  %v409_v53 = vmul.f32 %v2246_v3, %v2239_v14  ;;  %v1775_v41 = vrot.slane %v1750_v0, 1 }
 0x3bb   : > { %v369_v15 = vsel %vm296_vm6, %v2241_v24, 0.0  ;;  %v410_v32 = vmul.f32 %v2247_v10, %v2241_v24  ;;  %v420_v47 = vsel %vm245_vm2, %v408_v1, 0.0 }
 0x3bc   : > { %v370_v44 = vadd.f32 %v369_v15, %v368_v51  ;;  %v1841_v7 = vpop.permute.xlu0 %1840  ;;  %1897 = vrot.lane.b32.xlu1 %v1884_v31, %s2259_s13  ;;  %v421_v46 = vsel %vm245_vm2, %v409_v53, 0.0 }
 0x3bd   : > { %v1854_v19 = vmul.f32 %v1841_v7, %v1806_v26  ;;  %v422_v55 = vadd.f32 %v421_v46, %v420_v47  ;;  %v423_v62 = vsel %vm252_vm4, %v410_v32, 0.0 }
 0x3be   : > { %v371_v30 = vrot.slane %v370_v44, 4 }
 0x3bf   : > { %v1873_v2 = vrot.slane %v1854_v19, 7  ;;  %v424_v42 = vadd.f32 %v423_v62, %v422_v55 }
 0x3c0   : > { %v372_v58 = vadd.f32 %v371_v30, %v370_v44 }
 0x3c1   : > { %v1885_v5 = vsel %vm296_vm6, %v2889_v56, %v1873_v2  ;;  %v425_v43 = vrot.slane %v424_v42, 4  ;;  %v1791_v56 = vsel %vm545_vm1, %v1788_v21, %v1790_v28 }
 0x3c2   : > { %v373_v39 = vrot.slane %v372_v58, 2  ;;  %1907 = vrot.lane.b32.xlu0 %v1885_v5, %s2258_s12  ;;  %v1807_v33 = vadd.f32 %v1791_v56, %v2896_v57 }
 0x3c3   : > { %v426_v17 = vadd.f32 %v425_v43, %v424_v42 }
 0x3c4   : > { %v374_v9 = vadd.f32 %v373_v39, %v372_v58  ;;  %v1816_v23 = vpop.permute.xlu1 %1815 }
 0x3c5   : > { %v427_v34 = vrot.slane %v426_v17, 2 }
 0x3c6   : > { %v375_v52 = vrot.slane %v374_v9, 1 }
 0x3c7   : > { %v428_v63 = vadd.f32 %v427_v34, %v426_v17 }
 0x3c8   : > { %v376_v12 = vadd.f32 %v375_v52, %v374_v9 }
 0x3c9   : > { %v429_v18 = vrot.slane %v428_v63, 1 }
 0x3ca   : > { %2242 = vrcp.f32 %v376_v12 }
 0x3cb   : > { %v430_v60 = vadd.f32 %v429_v18, %v428_v63 }
 0x3d4   : > { %v2243_v49 = vpop.eup %2242 }
 0x3d5   : > { %v464_v61 = vmul.f32 %v2243_v49, %v430_v60 }
 0x3f0   : > { %v1846_v40 = vpop.permute.xlu0 %1845 }
 0x3f1   : > { %v1855_v11 = vmul.f32 %v1846_v40, %v1807_v33 }
 0x3f3   : > { %v1874_v6 = vrot.slane %v1855_v11, 7 }
 0x3f4   : > { %v1686_v22 = vpop.permute.xlu0 %1685 }
 0x3f5   : > { %1911 = vrot.lane.b32.xlu0 %v1874_v6, %s2258_s12  ;;  %v1875_v16 = vsel %vm296_vm6, %v1873_v2, %v1874_v6  ;;  %v1748_v27 = vmul.f32 %v1735_v48, %v1686_v22 }
 0x3f6   : > { %1909 = vrot.lane.b32.xlu1 %v1875_v16, %s2258_s12 }
 0x3f7   : > { %v1772_v29 = vrot.slane %v1748_v27, 1 }
 0x3f8   : > { %v1690_v20 = vpop.permute.xlu0 %1689 }
 0x3f9   : > { %v1749_v54 = vmul.f32 %v1735_v48, %v1690_v20 }
 0x3fb   : > { %v1773_v57 = vrot.slane %v1749_v54, 1 }
 0x3fc   : > { %v1811_v59 = vpop.permute.xlu0 %1810 }
 0x3fd   : > { %v1776_v37 = vsel %vm545_vm1, %v1773_v57, %v1775_v41  ;;  %v1774_v25 = vsel %vm545_vm1, %v1772_v29, %v1773_v57 }
 0x3fe   : > { %v1801_v31 = vadd.f32 %v1776_v37, %v2813_v35  ;;  %v1800_v21 = vadd.f32 %v1774_v25, %v2804_v13 }
 0x400   : > { %v1848_v45 = vmul.f32 %v1811_v59, %v1800_v21  ;;  %v1849_v8 = vmul.f32 %v1816_v23, %v1801_v31 }
 0x402   : > { %v1864_v14 = vrot.slane %v1848_v45, 7  ;;  %v1865_v4 = vrot.slane %v1849_v8, 7 }
 0x404   : > { %v1866_v1 = vsel %vm296_vm6, %v1864_v14, %v1865_v4  ;;  %v1882_v24 = vsel %vm296_vm6, %v464_v61, %v1864_v14 }
 0x422   : > { %v1892_v38 = vpop.permute.xlu0 %1891 }
 0x423   : > { %v1890_v51 = vpop.permute.xlu1 %1889  ;;  %v1918_v47 = vsel %vm245_vm2, %v1865_v4, %v1892_v38 }
 0x424   : > { %v1917_v44 = vsel %vm245_vm2, %v1866_v1, %v1890_v51 }
 0x426   : > { %v1888_v3 = vpop.permute.xlu0 %1887 }
 0x427   : > { %v1916_v13 = vsel %vm245_vm2, %v1882_v24, %v1888_v3 }
 0x42a   : > { %v1902_v53 = vpop.permute.xlu1 %1901 }
 0x42b   : > { %v1900_v26 = vpop.permute.xlu0 %1899  ;;  %v1922_v7 = vsel %vm1919_vm9, %v1918_v47, %v1902_v53 }
 0x42c   : > { %v1921_v19 = vsel %vm1919_vm9, %v1917_v44, %v1900_v26 }
 0x42e   : > { %v1898_v15 = vpop.permute.xlu1 %1897 }
 0x42f   : > { %v1920_v35 = vsel %vm1919_vm9, %v1916_v13, %v1898_v15 }
 0x434   : > { %v1908_v10 = vpop.permute.xlu0 %1907 }
 0x435   : > { %v1924_v32 = vsel %vm1923_vm8, %v1920_v35, %v1908_v10 }
 0x436   : > { %1927 = vst [vmem:[%s116_s18] sm:$0xff] %v1924_v32 }
 0x467   : > { %v1912_v46 = vpop.permute.xlu0 %1911 }
 0x468   : > { %v1926_v55 = vsel %vm1923_vm8, %v1922_v7, %v1912_v46  ;;  %v1910_v30 = vpop.permute.xlu1 %1909 }
 0x469   : > { %1929 = vst [vmem:[%s116_s18 + $0x10] sm:$0x1] %v1926_v55  ;;  %v1925_v62 = vsel %vm1923_vm8, %v1921_v19, %v1910_v30 }
 0x46a   : > { %1928 = vst [vmem:[%s116_s18 + $0x8] sm:$0xff] %v1925_v62 }
 0x46b PF: > { %s11_s6 = sadd.s32 1, %s2254_s6  }
 0x46c   : > { %p8_p4 = scmp.ge.s32.totalorder %s11_s6, 4  }
 0x46e   :  { %10 = sbr.rel (!%p8_p4) target bundleno = 1 (0x1), region = 54 }

</bundles_post_ra>
